<compile_context>
chip_gen: v5e
topology: v5e:2x2
jax: 0.10.0
libtpu: 0.0.40
codegen_flags: <defaults>
</compile_context>

<pallas_src>
import jax
import jax.numpy as jnp
from jax import lax
from jax.experimental import pallas as pl
from jax.experimental.pallas import tpu as pltpu

EPS = 1e-5
NEG_SLOPE = 0.2
# 3x3 non-center taps in (kh, kw) order; the center tap (0, 0) is handled by a
# separate small matmul that reads the xpad interior directly (no copy).
TAPS8 = [(dh, dw) for dh in (-1, 0, 1) for dw in (-1, 0, 1) if (dh, dw) != (0, 0)]


def _pick_tile(hw, cap=4096):
    """Largest lane-aligned divisor of hw that is <= cap (falls back to hw)."""
    if hw <= cap:
        return hw
    t = (cap // 128) * 128
    while t >= 128:
        if hw % t == 0:
            return t
        t -= 128
    for t in range(cap, 0, -1):
        if hw % t == 0:
            return t
    return hw


def _vmem_limit_bytes(needed_bytes):
    """Clamp the scoped-VMEM request to 75% of physical VMEM (headroom)."""
    try:
        info = pltpu.get_tpu_info()
        phys = int(getattr(info, "vmem_capacity_bytes", 64 * 1024 * 1024))
    except Exception:
        phys = 64 * 1024 * 1024          # conservative: v7x per-TC VMEM
    lo = 16 * 1024 * 1024
    hi = (phys * 3) // 4                 # leave room for compiler temps
    return max(lo, min(int(needed_bytes), hi))


def residual_layer(x_nchw, w1_oihw, g1, b1, w2_oihw, g2, b2,
                   *, mm_dtype=jnp.bfloat16, tile_cap=4096):
    """ResidualLayer forward.  x: (N, C, H, W), conv weights: (C, C, 3, 3)."""
    N, C, H, W = x_nchw.shape
    HW = H * W
    # Lane padding on each side of the flattened pixel axis: >= W+1 and a
    # multiple of 128 so interior writes / tap windows stay lane-aligned.
    PAD = max(128, ((W + 1 + 127) // 128) * 128)
    TILE = _pick_tile(HW, tile_cap)      # lane chunk for the im2col/matmul loop
    NT = HW // TILE
    inv_n = 1.0 / float(HW)
    mm_b = jnp.dtype(mm_dtype).itemsize
    x_b = jnp.dtype(x_nchw.dtype).itemsize

    # ---- wrapper-side (tiny, one-off) parameter prep -----------------------
    # (C_out, C_in, kh, kw) -> (C_out, kh, kw, C_in); split off the center tap.
    def split_weights(w):
        wk = jnp.transpose(w, (0, 2, 3, 1))                       # (C,3,3,C)
        w8 = jnp.concatenate(
            [wk[:, dh + 1, dw + 1, :] for (dh, dw) in TAPS8], axis=1)  # (C,8C)
        wc = wk[:, 1, 1, :]                                        # (C, C)
        return w8.astype(mm_dtype), wc.astype(mm_dtype)

    w1t, w1c = split_weights(w1_oihw)
    w2t, w2c = split_weights(w2_oihw)
    g1c = g1.reshape(C, 1).astype(jnp.float32)
    b1c = b1.reshape(C, 1).astype(jnp.float32)
    g2c = g2.reshape(C, 1).astype(jnp.float32)
    b2c = b2.reshape(C, 1).astype(jnp.float32)
    # W-boundary masks in mm_dtype (the H boundary is handled by zero pads):
    #   row 0: 0 where w == 0     (for dw = -1 taps)
    #   row 1: 0 where w == W-1   (for dw = +1 taps)
    w_idx = jnp.tile(jnp.arange(W, dtype=jnp.int32), H)
    wmask = jnp.stack([w_idx != 0, w_idx != W - 1], axis=0).astype(mm_dtype)

    x2d = x_nchw.reshape(N, C, HW)          # free, contiguous reshape

    def kernel(x_ref, wmask_ref, w1t_ref, w1c_ref, g1_ref, b1_ref,
               w2t_ref, w2c_ref, g2_ref, b2_ref, o_ref,
               xpad_ref, patch_ref, ybuf_ref):
        # Zero ONLY the two lane-pad strips (interior writes never touch them).
        xpad_ref[:, :PAD] = jnp.zeros((C, PAD), mm_dtype)
        xpad_ref[:, PAD + HW:] = jnp.zeros((C, PAD), mm_dtype)

        # conv1 input: cast the image straight into the staging buffer; no
        # full-image f32 copy is kept live across the body.
        xpad_ref[:, PAD:PAD + HW] = x_ref[0].astype(mm_dtype)

        def conv3x3(wt_ref, wc_ref):
            """Chunked im2col + K=8C MXU matmul (+ center matmul) per tile.
            Reads the xpad interior, writes ybuf (f32), returns (sum, sumsq)."""
            s1 = jnp.zeros((C, 1), jnp.float32)
            s2 = jnp.zeros((C, 1), jnp.float32)
            for ti in range(NT):                          # statically unrolled
                q0 = ti * TILE
                m_neg = wmask_ref[0:1, q0:q0 + TILE]      # mask for dw = -1
                m_pos = wmask_ref[1:2, q0:q0 + TILE]      # mask for dw = +1
                for t, (dh, dw) in enumerate(TAPS8):
                    d = dh * W + dw
                    s = xpad_ref[:, PAD + q0 + d:PAD + q0 + d + TILE]
                    if dw == -1:
                        s = s * m_neg
                    elif dw == 1:
                        s = s * m_pos
                    patch_ref[t * C:(t + 1) * C, :] = s
                y = jnp.dot(wt_ref[...], patch_ref[...],
                            preferred_element_type=jnp.float32)
                y = y + jnp.dot(wc_ref[...],
                                xpad_ref[:, PAD + q0:PAD + q0 + TILE],
                                preferred_element_type=jnp.float32)
                ybuf_ref[:, q0:q0 + TILE] = y
                s1 = s1 + jnp.sum(y, axis=1, keepdims=True)
                s2 = s2 + jnp.sum(y * y, axis=1, keepdims=True)
            return s1, s2

        def norm_coeffs(s1, s2, g_ref, b_ref):
            mean = s1 * inv_n
            # Single-pass (biased) variance; clamp against cancellation.
            var = jnp.maximum(s2 * inv_n - mean * mean, 0.0)
            scale = g_ref[...] * lax.rsqrt(var + EPS)
            bias = b_ref[...] - mean * scale
            return scale, bias

        # ---- conv1 -> InstanceNorm1 -> LeakyReLU, staged back for conv2 ----
        s1, s2 = conv3x3(w1t_ref, w1c_ref)
        scale, bias = norm_coeffs(s1, s2, g1_ref, b1_ref)
        for ti in range(NT):
            q0 = ti * TILE
            z = ybuf_ref[:, q0:q0 + TILE] * scale + bias
            z = jnp.where(z > 0, z, NEG_SLOPE * z)                # LeakyReLU
            xpad_ref[:, PAD + q0:PAD + q0 + TILE] = z.astype(mm_dtype)

        # ---- conv2 -> InstanceNorm2 -> residual add -------------------------
        s1, s2 = conv3x3(w2t_ref, w2c_ref)
        scale, bias = norm_coeffs(s1, s2, g2_ref, b2_ref)
        for ti in range(NT):
            q0 = ti * TILE
            y2 = ybuf_ref[:, q0:q0 + TILE] * scale + bias
            res = x_ref[0, :, q0:q0 + TILE].astype(jnp.float32)
            o_ref[0, :, q0:q0 + TILE] = (y2 + res).astype(o_ref.dtype)

    # ---- scoped-VMEM budget: real footprint + margin, clamped per chip -----
    block_bytes = (2 * C * HW * x_b                       # x block, dbl-buf
                   + 2 * C * HW * x_b                     # out block, dbl-buf
                   + 2 * 2 * HW * mm_b                    # W-boundary masks
                   + 2 * 2 * (8 * C * C + C * C) * mm_b   # w1/w2 taps+center
                   + 2 * 4 * C * 4)                       # gammas / betas
    scratch_bytes = (C * (HW + 2 * PAD) * mm_b            # xpad staging buffer
                     + C * HW * 4                         # ybuf f32 conv out
                     + 8 * C * TILE * mm_b)               # im2col patch (tile)
    needed = ((block_bytes + scratch_bytes) * 3) // 2 + (8 << 20)

    out = pl.pallas_call(
        kernel,
        out_shape=jax.ShapeDtypeStruct((N, C, HW), x_nchw.dtype),
        grid_spec=pltpu.PrefetchScalarGridSpec(
            num_scalar_prefetch=0,
            # TODO(synk): add a grid-level H*W-tile axis (halo + two-phase
            # cross-tile InstanceNorm stats) so xpad/ybuf stop scaling with
            # resolution, and a second "parallel" axis to feed both v7x
            # TensorCores when N == 1.
            grid=(N,),
            in_specs=[
                pl.BlockSpec((1, C, HW), lambda n: (n, 0, 0)),    # x (C, HW)
                pl.BlockSpec((2, HW), lambda n: (0, 0)),          # W masks
                pl.BlockSpec((C, 8 * C), lambda n: (0, 0)),       # w1 taps
                pl.BlockSpec((C, C), lambda n: (0, 0)),           # w1 center
                pl.BlockSpec((C, 1), lambda n: (0, 0)),           # gamma1
                pl.BlockSpec((C, 1), lambda n: (0, 0)),           # beta1
                pl.BlockSpec((C, 8 * C), lambda n: (0, 0)),       # w2 taps
                pl.BlockSpec((C, C), lambda n: (0, 0)),           # w2 center
                pl.BlockSpec((C, 1), lambda n: (0, 0)),           # gamma2
                pl.BlockSpec((C, 1), lambda n: (0, 0)),           # beta2
            ],
            out_specs=pl.BlockSpec((1, C, HW), lambda n: (n, 0, 0)),
            scratch_shapes=[
                pltpu.VMEM((C, PAD + HW + PAD), mm_dtype),        # padded image
                pltpu.VMEM((8 * C, TILE), mm_dtype),              # im2col patch
                pltpu.VMEM((C, HW), jnp.float32),                 # conv output
            ],
        ),
        compiler_params=pltpu.CompilerParams(
            dimension_semantics=("parallel",),
            vmem_limit_bytes=_vmem_limit_bytes(needed)),
    )(x2d, wmask, w1t, w1c, g1c, b1c, w2t, w2c, g2c, b2c)

    return out.reshape(N, C, H, W)                        # free reshape back


def ref_forward(x, w1, g1, b1, w2, g2, b2):
    """Plain-JAX f32 reference (NCHW / OIHW), mirrors PyTorch semantics."""
    def conv(xin, w):
        return lax.conv_general_dilated(
            xin, w, window_strides=(1, 1), padding=((1, 1), (1, 1)),
            dimension_numbers=("NCHW", "OIHW", "NCHW"))

    def inorm(y, g, b):
        m = jnp.mean(y, axis=(2, 3), keepdims=True)
        v = jnp.mean((y - m) ** 2, axis=(2, 3), keepdims=True)
        return ((y - m) / jnp.sqrt(v + EPS)) * g.reshape(1, -1, 1, 1) \
            + b.reshape(1, -1, 1, 1)

    o1 = inorm(conv(x, w1), g1, b1)
    o1 = jnp.where(o1 > 0, o1, NEG_SLOPE * o1)
    o2 = inorm(conv(o1, w2), g2, b2)
    return o2 + x


if __name__ == "__main__":
    key = jax.random.PRNGKey(0)
    N, C, H, W = 2, 4, 16, 16
    kx, kw1, kw2, kg1, kb1, kg2, kb2 = jax.random.split(key, 7)

    x = jax.random.normal(kx, (N, C, H, W), jnp.float32)

    # Conv weights in PyTorch OIHW layout, non-trivial affine IN params.
    fan_in = C * 3 * 3
    bound = 1.0 / (fan_in ** 0.5)
    w1 = jax.random.uniform(kw1, (C, C, 3, 3), jnp.float32, -bound, bound)
    w2 = jax.random.uniform(kw2, (C, C, 3, 3), jnp.float32, -bound, bound)
    g1 = jax.random.uniform(kg1, (C,), jnp.float32, 0.5, 1.5)
    b1 = 0.1 * jax.random.normal(kb1, (C,), jnp.float32)
    g2 = jax.random.uniform(kg2, (C,), jnp.float32, 0.5, 1.5)
    b2 = 0.1 * jax.random.normal(kb2, (C,), jnp.float32)

    ref = ref_forward(x, w1, g1, b1, w2, g2, b2)

    # Strict structural check with f32 MXU operands.
    out_f32 = jax.block_until_ready(
        residual_layer(x, w1, g1, b1, w2, g2, b2, mm_dtype=jnp.float32))
    assert out_f32.shape == (N, C, H, W)
    err32 = jnp.max(jnp.abs(out_f32 - ref))
    assert jnp.allclose(out_f32, ref, atol=1e-3, rtol=1e-3), \
        f"f32 path max abs err {err32}"

    # Production bf16 MXU fast path (default): looser tolerance.
    out_bf16 = jax.block_until_ready(
        residual_layer(x, w1, g1, b1, w2, g2, b2, mm_dtype=jnp.bfloat16))
    err16 = jnp.max(jnp.abs(out_bf16 - ref))
    assert jnp.allclose(out_bf16, ref, atol=5e-2, rtol=5e-2), \
        f"bf16 path max abs err {err16}"

    print("KERNEL_OK")
</pallas_src>

<mosaic_0001>
module attributes {stable_mosaic.version = 11 : i64} {
  func.func @kernel(%arg0: i32, %arg1: memref<1x4x256xf32, #tpu.memory_space<vmem>>, %arg2: memref<2x256xf32, #tpu.memory_space<vmem>>, %arg3: memref<4x32xf32, #tpu.memory_space<vmem>>, %arg4: memref<4x4xf32, #tpu.memory_space<vmem>>, %arg5: memref<4x1xf32, #tpu.memory_space<vmem>>, %arg6: memref<4x1xf32, #tpu.memory_space<vmem>>, %arg7: memref<4x32xf32, #tpu.memory_space<vmem>>, %arg8: memref<4x4xf32, #tpu.memory_space<vmem>>, %arg9: memref<4x1xf32, #tpu.memory_space<vmem>>, %arg10: memref<4x1xf32, #tpu.memory_space<vmem>>, %arg11: memref<1x4x256xf32, #tpu.memory_space<vmem>>, %arg12: memref<4x512xf32, #tpu.memory_space<vmem>>, %arg13: memref<32x256xf32, #tpu.memory_space<vmem>>, %arg14: memref<4x256xf32, #tpu.memory_space<vmem>>) attributes {dimension_semantics = [#tpu.dimension_semantics<parallel>], iteration_bounds = array<i64: 2>, scalar_prefetch = 0 : i64, scratch_operands = 3 : i64, tpu.core_type = #tpu.core_type<tc>, window_params = [{transform_indices = @transform_0, window_bounds = array<i64: 1, 4, 256>}, {pipeline_mode = #tpu.pipeline_mode<synchronous>, transform_indices = @transform_1, window_bounds = array<i64: 2, 256>}, {pipeline_mode = #tpu.pipeline_mode<synchronous>, transform_indices = @transform_2, window_bounds = array<i64: 4, 32>}, {pipeline_mode = #tpu.pipeline_mode<synchronous>, transform_indices = @transform_3, window_bounds = array<i64: 4, 4>}, {pipeline_mode = #tpu.pipeline_mode<synchronous>, transform_indices = @transform_4, window_bounds = array<i64: 4, 1>}, {pipeline_mode = #tpu.pipeline_mode<synchronous>, transform_indices = @transform_5, window_bounds = array<i64: 4, 1>}, {pipeline_mode = #tpu.pipeline_mode<synchronous>, transform_indices = @transform_6, window_bounds = array<i64: 4, 32>}, {pipeline_mode = #tpu.pipeline_mode<synchronous>, transform_indices = @transform_7, window_bounds = array<i64: 4, 4>}, {pipeline_mode = #tpu.pipeline_mode<synchronous>, transform_indices = @transform_8, window_bounds = array<i64: 4, 1>}, {pipeline_mode = #tpu.pipeline_mode<synchronous>, transform_indices = @transform_9, window_bounds = array<i64: 4, 1>}, {transform_indices = @transform_10, window_bounds = array<i64: 1, 4, 256>}]} {
    %cst = arith.constant 0.000000e+00 : f32
    %0 = vector.broadcast %cst : f32 to vector<4x128xf32>
    %c0 = arith.constant 0 : index
    %c0_0 = arith.constant 0 : index
    %1 = vector.load %arg12[%c0, %c0_0] : memref<4x512xf32, #tpu.memory_space<vmem>>, vector<4x128xf32>
    tpu.vector_store %arg12[%c0, %c0_0], %0 {strides = array<i32>} : memref<4x512xf32, #tpu.memory_space<vmem>>, vector<4x128xf32>,
    %cst_1 = arith.constant 0.000000e+00 : f32
    %2 = vector.broadcast %cst_1 : f32 to vector<4x128xf32>
    %c0_2 = arith.constant 0 : index
    %c384 = arith.constant 384 : index
    %3 = vector.load %arg12[%c0_2, %c384] : memref<4x512xf32, #tpu.memory_space<vmem>>, vector<4x128xf32>
    tpu.vector_store %arg12[%c0_2, %c384], %2 {strides = array<i32>} : memref<4x512xf32, #tpu.memory_space<vmem>>, vector<4x128xf32>,
    %c0_3 = arith.constant 0 : index
    %c0_4 = arith.constant 0 : index
    %c0_5 = arith.constant 0 : index
    %4 = vector.load %arg1[%c0_3, %c0_4, %c0_5] : memref<1x4x256xf32, #tpu.memory_space<vmem>>, vector<1x4x256xf32>
    %5 = vector.shape_cast %4 : vector<1x4x256xf32> to vector<4x256xf32>
    %c0_6 = arith.constant 0 : index
    %c128 = arith.constant 128 : index
    %6 = vector.load %arg12[%c0_6, %c128] : memref<4x512xf32, #tpu.memory_space<vmem>>, vector<4x256xf32>
    tpu.vector_store %arg12[%c0_6, %c128], %5 {strides = array<i32>} : memref<4x512xf32, #tpu.memory_space<vmem>>, vector<4x256xf32>,
    %cst_7 = arith.constant 0.000000e+00 : f32
    %7 = vector.broadcast %cst_7 : f32 to vector<4x1xf32>
    %cst_8 = arith.constant 0.000000e+00 : f32
    %8 = vector.broadcast %cst_8 : f32 to vector<4x1xf32>
    %c0_9 = arith.constant 0 : index
    %c0_10 = arith.constant 0 : index
    %9 = vector.load %arg2[%c0_9, %c0_10] : memref<2x256xf32, #tpu.memory_space<vmem>>, vector<1x256xf32>
    %c1 = arith.constant 1 : index
    %c0_11 = arith.constant 0 : index
    %10 = vector.load %arg2[%c1, %c0_11] : memref<2x256xf32, #tpu.memory_space<vmem>>, vector<1x256xf32>
    %c0_12 = arith.constant 0 : index
    %c111 = arith.constant 111 : index
    %11 = vector.load %arg12[%c0_12, %c111] : memref<4x512xf32, #tpu.memory_space<vmem>>, vector<4x256xf32>
    %12 = vector.broadcast %9 : vector<1x256xf32> to vector<4x256xf32>
    %13 = arith.mulf %11, %12 : vector<4x256xf32>
    %c0_13 = arith.constant 0 : index
    %c0_14 = arith.constant 0 : index
    %14 = vector.load %arg13[%c0_13, %c0_14] : memref<32x256xf32, #tpu.memory_space<vmem>>, vector<4x256xf32>
    tpu.vector_store %arg13[%c0_13, %c0_14], %13 {strides = array<i32>} : memref<32x256xf32, #tpu.memory_space<vmem>>, vector<4x256xf32>,
    %c0_15 = arith.constant 0 : index
    %c112 = arith.constant 112 : index
    %15 = vector.load %arg12[%c0_15, %c112] : memref<4x512xf32, #tpu.memory_space<vmem>>, vector<4x256xf32>
    %c4 = arith.constant 4 : index
    %c0_16 = arith.constant 0 : index
    %16 = vector.load %arg13[%c4, %c0_16] : memref<32x256xf32, #tpu.memory_space<vmem>>, vector<4x256xf32>
    tpu.vector_store %arg13[%c4, %c0_16], %15 {strides = array<i32>} : memref<32x256xf32, #tpu.memory_space<vmem>>, vector<4x256xf32>,
    %c0_17 = arith.constant 0 : index
    %c113 = arith.constant 113 : index
    %17 = vector.load %arg12[%c0_17, %c113] : memref<4x512xf32, #tpu.memory_space<vmem>>, vector<4x256xf32>
    %18 = vector.broadcast %10 : vector<1x256xf32> to vector<4x256xf32>
    %19 = arith.mulf %17, %18 : vector<4x256xf32>
    %c8 = arith.constant 8 : index
    %c0_18 = arith.constant 0 : index
    %20 = vector.load %arg13[%c8, %c0_18] : memref<32x256xf32, #tpu.memory_space<vmem>>, vector<4x256xf32>
    tpu.vector_store %arg13[%c8, %c0_18], %19 {strides = array<i32>} : memref<32x256xf32, #tpu.memory_space<vmem>>, vector<4x256xf32>,
    %c0_19 = arith.constant 0 : index
    %c127 = arith.constant 127 : index
    %21 = vector.load %arg12[%c0_19, %c127] : memref<4x512xf32, #tpu.memory_space<vmem>>, vector<4x256xf32>
    %22 = vector.broadcast %9 : vector<1x256xf32> to vector<4x256xf32>
    %23 = arith.mulf %21, %22 : vector<4x256xf32>
    %c12 = arith.constant 12 : index
    %c0_20 = arith.constant 0 : index
    %24 = vector.load %arg13[%c12, %c0_20] : memref<32x256xf32, #tpu.memory_space<vmem>>, vector<4x256xf32>
    tpu.vector_store %arg13[%c12, %c0_20], %23 {strides = array<i32>} : memref<32x256xf32, #tpu.memory_space<vmem>>, vector<4x256xf32>,
    %c0_21 = arith.constant 0 : index
    %c129 = arith.constant 129 : index
    %25 = vector.load %arg12[%c0_21, %c129] : memref<4x512xf32, #tpu.memory_space<vmem>>, vector<4x256xf32>
    %26 = vector.broadcast %10 : vector<1x256xf32> to vector<4x256xf32>
    %27 = arith.mulf %25, %26 : vector<4x256xf32>
    %c16 = arith.constant 16 : index
    %c0_22 = arith.constant 0 : index
    %28 = vector.load %arg13[%c16, %c0_22] : memref<32x256xf32, #tpu.memory_space<vmem>>, vector<4x256xf32>
    tpu.vector_store %arg13[%c16, %c0_22], %27 {strides = array<i32>} : memref<32x256xf32, #tpu.memory_space<vmem>>, vector<4x256xf32>,
    %c0_23 = arith.constant 0 : index
    %c143 = arith.constant 143 : index
    %29 = vector.load %arg12[%c0_23, %c143] : memref<4x512xf32, #tpu.memory_space<vmem>>, vector<4x256xf32>
    %30 = vector.broadcast %9 : vector<1x256xf32> to vector<4x256xf32>
    %31 = arith.mulf %29, %30 : vector<4x256xf32>
    %c20 = arith.constant 20 : index
    %c0_24 = arith.constant 0 : index
    %32 = vector.load %arg13[%c20, %c0_24] : memref<32x256xf32, #tpu.memory_space<vmem>>, vector<4x256xf32>
    tpu.vector_store %arg13[%c20, %c0_24], %31 {strides = array<i32>} : memref<32x256xf32, #tpu.memory_space<vmem>>, vector<4x256xf32>,
    %c0_25 = arith.constant 0 : index
    %c144 = arith.constant 144 : index
    %33 = vector.load %arg12[%c0_25, %c144] : memref<4x512xf32, #tpu.memory_space<vmem>>, vector<4x256xf32>
    %c24 = arith.constant 24 : index
    %c0_26 = arith.constant 0 : index
    %34 = vector.load %arg13[%c24, %c0_26] : memref<32x256xf32, #tpu.memory_space<vmem>>, vector<4x256xf32>
    tpu.vector_store %arg13[%c24, %c0_26], %33 {strides = array<i32>} : memref<32x256xf32, #tpu.memory_space<vmem>>, vector<4x256xf32>,
    %c0_27 = arith.constant 0 : index
    %c145 = arith.constant 145 : index
    %35 = vector.load %arg12[%c0_27, %c145] : memref<4x512xf32, #tpu.memory_space<vmem>>, vector<4x256xf32>
    %36 = vector.broadcast %10 : vector<1x256xf32> to vector<4x256xf32>
    %37 = arith.mulf %35, %36 : vector<4x256xf32>
    %c28 = arith.constant 28 : index
    %c0_28 = arith.constant 0 : index
    %38 = vector.load %arg13[%c28, %c0_28] : memref<32x256xf32, #tpu.memory_space<vmem>>, vector<4x256xf32>
    tpu.vector_store %arg13[%c28, %c0_28], %37 {strides = array<i32>} : memref<32x256xf32, #tpu.memory_space<vmem>>, vector<4x256xf32>,
    %c0_29 = arith.constant 0 : index
    %c0_30 = arith.constant 0 : index
    %39 = vector.load %arg3[%c0_29, %c0_30] : memref<4x32xf32, #tpu.memory_space<vmem>>, vector<4x32xf32>
    %c0_31 = arith.constant 0 : index
    %c0_32 = arith.constant 0 : index
    %40 = vector.load %arg13[%c0_31, %c0_32] : memref<32x256xf32, #tpu.memory_space<vmem>>, vector<32x256xf32>
    %cst_33 = arith.constant dense<0.000000e+00> : vector<4x256xf32>
    %41 = tpu.matmul %39, %40, %cst_33 {dimension_numbers = #tpu.dot_dimension_numbers<[1], [0], [0], [1], [0, 0, 1, 1], [], []>} : vector<4x32xf32>, vector<32x256xf32>, vector<4x256xf32> -> vector<4x256xf32>
    %c0_34 = arith.constant 0 : index
    %c0_35 = arith.constant 0 : index
    %42 = vector.load %arg4[%c0_34, %c0_35] : memref<4x4xf32, #tpu.memory_space<vmem>>, vector<4x4xf32>
    %c0_36 = arith.constant 0 : index
    %c128_37 = arith.constant 128 : index
    %43 = vector.load %arg12[%c0_36, %c128_37] : memref<4x512xf32, #tpu.memory_space<vmem>>, vector<4x256xf32>
    %cst_38 = arith.constant dense<0.000000e+00> : vector<4x256xf32>
    %44 = tpu.matmul %42, %43, %cst_38 {dimension_numbers = #tpu.dot_dimension_numbers<[1], [0], [0], [1], [0, 0, 1, 1], [], []>} : vector<4x4xf32>, vector<4x256xf32>, vector<4x256xf32> -> vector<4x256xf32>
    %45 = arith.addf %41, %44 : vector<4x256xf32>
    %c0_39 = arith.constant 0 : index
    %c0_40 = arith.constant 0 : index
    %46 = vector.load %arg14[%c0_39, %c0_40] : memref<4x256xf32, #tpu.memory_space<vmem>>, vector<4x256xf32>
    tpu.vector_store %arg14[%c0_39, %c0_40], %45 {strides = array<i32>} : memref<4x256xf32, #tpu.memory_space<vmem>>, vector<4x256xf32>,
    %cst_41 = arith.constant dense<0.000000e+00> : vector<4xf32>
    %47 = vector.multi_reduction <add>, %45, %cst_41 [1] : vector<4x256xf32> to vector<4xf32>
    %48 = vector.shape_cast %47 : vector<4xf32> to vector<4x1xf32>
    %49 = arith.addf %7, %48 : vector<4x1xf32>
    %50 = arith.mulf %45, %45 : vector<4x256xf32>
    %cst_42 = arith.constant dense<0.000000e+00> : vector<4xf32>
    %51 = vector.multi_reduction <add>, %50, %cst_42 [1] : vector<4x256xf32> to vector<4xf32>
    %52 = vector.shape_cast %51 : vector<4xf32> to vector<4x1xf32>
    %53 = arith.addf %8, %52 : vector<4x1xf32>
    %cst_43 = arith.constant 3.906250e-03 : f32
    %54 = vector.broadcast %cst_43 : f32 to vector<4x1xf32>
    %55 = arith.mulf %49, %54 : vector<4x1xf32>
    %cst_44 = arith.constant 3.906250e-03 : f32
    %56 = vector.broadcast %cst_44 : f32 to vector<4x1xf32>
    %57 = arith.mulf %53, %56 : vector<4x1xf32>
    %58 = arith.mulf %55, %55 : vector<4x1xf32>
    %59 = arith.subf %57, %58 : vector<4x1xf32>
    %cst_45 = arith.constant 0.000000e+00 : f32
    %60 = vector.broadcast %cst_45 : f32 to vector<4x1xf32>
    %61 = arith.maximumf %59, %60 : vector<4x1xf32>
    %c0_46 = arith.constant 0 : index
    %c0_47 = arith.constant 0 : index
    %62 = vector.load %arg5[%c0_46, %c0_47] : memref<4x1xf32, #tpu.memory_space<vmem>>, vector<4x1xf32>
    %cst_48 = arith.constant 9.99999974E-6 : f32
    %63 = vector.broadcast %cst_48 : f32 to vector<4x1xf32>
    %64 = arith.addf %61, %63 : vector<4x1xf32>
    %65 = math.rsqrt %64 : vector<4x1xf32>
    %66 = arith.mulf %62, %65 : vector<4x1xf32>
    %c0_49 = arith.constant 0 : index
    %c0_50 = arith.constant 0 : index
    %67 = vector.load %arg6[%c0_49, %c0_50] : memref<4x1xf32, #tpu.memory_space<vmem>>, vector<4x1xf32>
    %68 = arith.mulf %55, %66 : vector<4x1xf32>
    %69 = arith.subf %67, %68 : vector<4x1xf32>
    %c0_51 = arith.constant 0 : index
    %c0_52 = arith.constant 0 : index
    %70 = vector.load %arg14[%c0_51, %c0_52] : memref<4x256xf32, #tpu.memory_space<vmem>>, vector<4x256xf32>
    %71 = vector.broadcast %66 : vector<4x1xf32> to vector<4x256xf32>
    %72 = arith.mulf %70, %71 : vector<4x256xf32>
    %73 = vector.broadcast %69 : vector<4x1xf32> to vector<4x256xf32>
    %74 = arith.addf %72, %73 : vector<4x256xf32>
    %cst_53 = arith.constant 0.000000e+00 : f32
    %75 = vector.broadcast %cst_53 : f32 to vector<4x256xf32>
    %76 = arith.cmpf ogt, %74, %75 : vector<4x256xf32>
    %cst_54 = arith.constant 2.000000e-01 : f32
    %77 = vector.broadcast %cst_54 : f32 to vector<4x256xf32>
    %78 = arith.mulf %77, %74 : vector<4x256xf32>
    %79 = arith.select %76, %74, %78 : vector<4x256xi1>, vector<4x256xf32>
    %c0_55 = arith.constant 0 : index
    %c128_56 = arith.constant 128 : index
    %80 = vector.load %arg12[%c0_55, %c128_56] : memref<4x512xf32, #tpu.memory_space<vmem>>, vector<4x256xf32>
    tpu.vector_store %arg12[%c0_55, %c128_56], %79 {strides = array<i32>} : memref<4x512xf32, #tpu.memory_space<vmem>>, vector<4x256xf32>,
    %cst_57 = arith.constant 0.000000e+00 : f32
    %81 = vector.broadcast %cst_57 : f32 to vector<4x1xf32>
    %cst_58 = arith.constant 0.000000e+00 : f32
    %82 = vector.broadcast %cst_58 : f32 to vector<4x1xf32>
    %c0_59 = arith.constant 0 : index
    %c0_60 = arith.constant 0 : index
    %83 = vector.load %arg2[%c0_59, %c0_60] : memref<2x256xf32, #tpu.memory_space<vmem>>, vector<1x256xf32>
    %c1_61 = arith.constant 1 : index
    %c0_62 = arith.constant 0 : index
    %84 = vector.load %arg2[%c1_61, %c0_62] : memref<2x256xf32, #tpu.memory_space<vmem>>, vector<1x256xf32>
    %c0_63 = arith.constant 0 : index
    %c111_64 = arith.constant 111 : index
    %85 = vector.load %arg12[%c0_63, %c111_64] : memref<4x512xf32, #tpu.memory_space<vmem>>, vector<4x256xf32>
    %86 = vector.broadcast %83 : vector<1x256xf32> to vector<4x256xf32>
    %87 = arith.mulf %85, %86 : vector<4x256xf32>
    %c0_65 = arith.constant 0 : index
    %c0_66 = arith.constant 0 : index
    %88 = vector.load %arg13[%c0_65, %c0_66] : memref<32x256xf32, #tpu.memory_space<vmem>>, vector<4x256xf32>
    tpu.vector_store %arg13[%c0_65, %c0_66], %87 {strides = array<i32>} : memref<32x256xf32, #tpu.memory_space<vmem>>, vector<4x256xf32>,
    %c0_67 = arith.constant 0 : index
    %c112_68 = arith.constant 112 : index
    %89 = vector.load %arg12[%c0_67, %c112_68] : memref<4x512xf32, #tpu.memory_space<vmem>>, vector<4x256xf32>
    %c4_69 = arith.constant 4 : index
    %c0_70 = arith.constant 0 : index
    %90 = vector.load %arg13[%c4_69, %c0_70] : memref<32x256xf32, #tpu.memory_space<vmem>>, vector<4x256xf32>
    tpu.vector_store %arg13[%c4_69, %c0_70], %89 {strides = array<i32>} : memref<32x256xf32, #tpu.memory_space<vmem>>, vector<4x256xf32>,
    %c0_71 = arith.constant 0 : index
    %c113_72 = arith.constant 113 : index
    %91 = vector.load %arg12[%c0_71, %c113_72] : memref<4x512xf32, #tpu.memory_space<vmem>>, vector<4x256xf32>
    %92 = vector.broadcast %84 : vector<1x256xf32> to vector<4x256xf32>
    %93 = arith.mulf %91, %92 : vector<4x256xf32>
    %c8_73 = arith.constant 8 : index
    %c0_74 = arith.constant 0 : index
    %94 = vector.load %arg13[%c8_73, %c0_74] : memref<32x256xf32, #tpu.memory_space<vmem>>, vector<4x256xf32>
    tpu.vector_store %arg13[%c8_73, %c0_74], %93 {strides = array<i32>} : memref<32x256xf32, #tpu.memory_space<vmem>>, vector<4x256xf32>,
    %c0_75 = arith.constant 0 : index
    %c127_76 = arith.constant 127 : index
    %95 = vector.load %arg12[%c0_75, %c127_76] : memref<4x512xf32, #tpu.memory_space<vmem>>, vector<4x256xf32>
    %96 = vector.broadcast %83 : vector<1x256xf32> to vector<4x256xf32>
    %97 = arith.mulf %95, %96 : vector<4x256xf32>
    %c12_77 = arith.constant 12 : index
    %c0_78 = arith.constant 0 : index
    %98 = vector.load %arg13[%c12_77, %c0_78] : memref<32x256xf32, #tpu.memory_space<vmem>>, vector<4x256xf32>
    tpu.vector_store %arg13[%c12_77, %c0_78], %97 {strides = array<i32>} : memref<32x256xf32, #tpu.memory_space<vmem>>, vector<4x256xf32>,
    %c0_79 = arith.constant 0 : index
    %c129_80 = arith.constant 129 : index
    %99 = vector.load %arg12[%c0_79, %c129_80] : memref<4x512xf32, #tpu.memory_space<vmem>>, vector<4x256xf32>
    %100 = vector.broadcast %84 : vector<1x256xf32> to vector<4x256xf32>
    %101 = arith.mulf %99, %100 : vector<4x256xf32>
    %c16_81 = arith.constant 16 : index
    %c0_82 = arith.constant 0 : index
    %102 = vector.load %arg13[%c16_81, %c0_82] : memref<32x256xf32, #tpu.memory_space<vmem>>, vector<4x256xf32>
    tpu.vector_store %arg13[%c16_81, %c0_82], %101 {strides = array<i32>} : memref<32x256xf32, #tpu.memory_space<vmem>>, vector<4x256xf32>,
    %c0_83 = arith.constant 0 : index
    %c143_84 = arith.constant 143 : index
    %103 = vector.load %arg12[%c0_83, %c143_84] : memref<4x512xf32, #tpu.memory_space<vmem>>, vector<4x256xf32>
    %104 = vector.broadcast %83 : vector<1x256xf32> to vector<4x256xf32>
    %105 = arith.mulf %103, %104 : vector<4x256xf32>
    %c20_85 = arith.constant 20 : index
    %c0_86 = arith.constant 0 : index
    %106 = vector.load %arg13[%c20_85, %c0_86] : memref<32x256xf32, #tpu.memory_space<vmem>>, vector<4x256xf32>
    tpu.vector_store %arg13[%c20_85, %c0_86], %105 {strides = array<i32>} : memref<32x256xf32, #tpu.memory_space<vmem>>, vector<4x256xf32>,
    %c0_87 = arith.constant 0 : index
    %c144_88 = arith.constant 144 : index
    %107 = vector.load %arg12[%c0_87, %c144_88] : memref<4x512xf32, #tpu.memory_space<vmem>>, vector<4x256xf32>
    %c24_89 = arith.constant 24 : index
    %c0_90 = arith.constant 0 : index
    %108 = vector.load %arg13[%c24_89, %c0_90] : memref<32x256xf32, #tpu.memory_space<vmem>>, vector<4x256xf32>
    tpu.vector_store %arg13[%c24_89, %c0_90], %107 {strides = array<i32>} : memref<32x256xf32, #tpu.memory_space<vmem>>, vector<4x256xf32>,
    %c0_91 = arith.constant 0 : index
    %c145_92 = arith.constant 145 : index
    %109 = vector.load %arg12[%c0_91, %c145_92] : memref<4x512xf32, #tpu.memory_space<vmem>>, vector<4x256xf32>
    %110 = vector.broadcast %84 : vector<1x256xf32> to vector<4x256xf32>
    %111 = arith.mulf %109, %110 : vector<4x256xf32>
    %c28_93 = arith.constant 28 : index
    %c0_94 = arith.constant 0 : index
    %112 = vector.load %arg13[%c28_93, %c0_94] : memref<32x256xf32, #tpu.memory_space<vmem>>, vector<4x256xf32>
    tpu.vector_store %arg13[%c28_93, %c0_94], %111 {strides = array<i32>} : memref<32x256xf32, #tpu.memory_space<vmem>>, vector<4x256xf32>,
    %c0_95 = arith.constant 0 : index
    %c0_96 = arith.constant 0 : index
    %113 = vector.load %arg7[%c0_95, %c0_96] : memref<4x32xf32, #tpu.memory_space<vmem>>, vector<4x32xf32>
    %c0_97 = arith.constant 0 : index
    %c0_98 = arith.constant 0 : index
    %114 = vector.load %arg13[%c0_97, %c0_98] : memref<32x256xf32, #tpu.memory_space<vmem>>, vector<32x256xf32>
    %cst_99 = arith.constant dense<0.000000e+00> : vector<4x256xf32>
    %115 = tpu.matmul %113, %114, %cst_99 {dimension_numbers = #tpu.dot_dimension_numbers<[1], [0], [0], [1], [0, 0, 1, 1], [], []>} : vector<4x32xf32>, vector<32x256xf32>, vector<4x256xf32> -> vector<4x256xf32>
    %c0_100 = arith.constant 0 : index
    %c0_101 = arith.constant 0 : index
    %116 = vector.load %arg8[%c0_100, %c0_101] : memref<4x4xf32, #tpu.memory_space<vmem>>, vector<4x4xf32>
    %c0_102 = arith.constant 0 : index
    %c128_103 = arith.constant 128 : index
    %117 = vector.load %arg12[%c0_102, %c128_103] : memref<4x512xf32, #tpu.memory_space<vmem>>, vector<4x256xf32>
    %cst_104 = arith.constant dense<0.000000e+00> : vector<4x256xf32>
    %118 = tpu.matmul %116, %117, %cst_104 {dimension_numbers = #tpu.dot_dimension_numbers<[1], [0], [0], [1], [0, 0, 1, 1], [], []>} : vector<4x4xf32>, vector<4x256xf32>, vector<4x256xf32> -> vector<4x256xf32>
    %119 = arith.addf %115, %118 : vector<4x256xf32>
    %c0_105 = arith.constant 0 : index
    %c0_106 = arith.constant 0 : index
    %120 = vector.load %arg14[%c0_105, %c0_106] : memref<4x256xf32, #tpu.memory_space<vmem>>, vector<4x256xf32>
    tpu.vector_store %arg14[%c0_105, %c0_106], %119 {strides = array<i32>} : memref<4x256xf32, #tpu.memory_space<vmem>>, vector<4x256xf32>,
    %cst_107 = arith.constant dense<0.000000e+00> : vector<4xf32>
    %121 = vector.multi_reduction <add>, %119, %cst_107 [1] : vector<4x256xf32> to vector<4xf32>
    %122 = vector.shape_cast %121 : vector<4xf32> to vector<4x1xf32>
    %123 = arith.addf %81, %122 : vector<4x1xf32>
    %124 = arith.mulf %119, %119 : vector<4x256xf32>
    %cst_108 = arith.constant dense<0.000000e+00> : vector<4xf32>
    %125 = vector.multi_reduction <add>, %124, %cst_108 [1] : vector<4x256xf32> to vector<4xf32>
    %126 = vector.shape_cast %125 : vector<4xf32> to vector<4x1xf32>
    %127 = arith.addf %82, %126 : vector<4x1xf32>
    %cst_109 = arith.constant 3.906250e-03 : f32
    %128 = vector.broadcast %cst_109 : f32 to vector<4x1xf32>
    %129 = arith.mulf %123, %128 : vector<4x1xf32>
    %cst_110 = arith.constant 3.906250e-03 : f32
    %130 = vector.broadcast %cst_110 : f32 to vector<4x1xf32>
    %131 = arith.mulf %127, %130 : vector<4x1xf32>
    %132 = arith.mulf %129, %129 : vector<4x1xf32>
    %133 = arith.subf %131, %132 : vector<4x1xf32>
    %cst_111 = arith.constant 0.000000e+00 : f32
    %134 = vector.broadcast %cst_111 : f32 to vector<4x1xf32>
    %135 = arith.maximumf %133, %134 : vector<4x1xf32>
    %c0_112 = arith.constant 0 : index
    %c0_113 = arith.constant 0 : index
    %136 = vector.load %arg9[%c0_112, %c0_113] : memref<4x1xf32, #tpu.memory_space<vmem>>, vector<4x1xf32>
    %cst_114 = arith.constant 9.99999974E-6 : f32
    %137 = vector.broadcast %cst_114 : f32 to vector<4x1xf32>
    %138 = arith.addf %135, %137 : vector<4x1xf32>
    %139 = math.rsqrt %138 : vector<4x1xf32>
    %140 = arith.mulf %136, %139 : vector<4x1xf32>
    %c0_115 = arith.constant 0 : index
    %c0_116 = arith.constant 0 : index
    %141 = vector.load %arg10[%c0_115, %c0_116] : memref<4x1xf32, #tpu.memory_space<vmem>>, vector<4x1xf32>
    %142 = arith.mulf %129, %140 : vector<4x1xf32>
    %143 = arith.subf %141, %142 : vector<4x1xf32>
    %c0_117 = arith.constant 0 : index
    %c0_118 = arith.constant 0 : index
    %144 = vector.load %arg14[%c0_117, %c0_118] : memref<4x256xf32, #tpu.memory_space<vmem>>, vector<4x256xf32>
    %145 = vector.broadcast %140 : vector<4x1xf32> to vector<4x256xf32>
    %146 = arith.mulf %144, %145 : vector<4x256xf32>
    %147 = vector.broadcast %143 : vector<4x1xf32> to vector<4x256xf32>
    %148 = arith.addf %146, %147 : vector<4x256xf32>
    %c0_119 = arith.constant 0 : index
    %c0_120 = arith.constant 0 : index
    %c0_121 = arith.constant 0 : index
    %149 = vector.load %arg1[%c0_119, %c0_120, %c0_121] : memref<1x4x256xf32, #tpu.memory_space<vmem>>, vector<1x4x256xf32>
    %150 = vector.shape_cast %149 : vector<1x4x256xf32> to vector<4x256xf32>
    %151 = arith.addf %148, %150 : vector<4x256xf32>
    %c0_122 = arith.constant 0 : index
    %c0_123 = arith.constant 0 : index
    %c0_124 = arith.constant 0 : index
    %152 = vector.load %arg11[%c0_122, %c0_123, %c0_124] : memref<1x4x256xf32, #tpu.memory_space<vmem>>, vector<1x4x256xf32>
    %153 = vector.shape_cast %152 : vector<1x4x256xf32> to vector<4x256xf32>
    %154 = vector.shape_cast %151 : vector<4x256xf32> to vector<1x4x256xf32>
    tpu.vector_store %arg11[%c0_122, %c0_123, %c0_124], %154 {strides = array<i32>} : memref<1x4x256xf32, #tpu.memory_space<vmem>>, vector<1x4x256xf32>,
    return
  }
  func.func @transform_0(%arg0: i32) -> (i32, i32, i32) {
    %c0_i32 = arith.constant 0 : i32
    %c0_i32_0 = arith.constant 0 : i32
    %c0_i32_1 = arith.constant 0 : i32
    return %arg0, %c0_i32, %c0_i32_0 : i32, i32, i32
  }
  func.func @transform_1(%arg0: i32) -> (i32, i32) {
    %c0_i32 = arith.constant 0 : i32
    %c0_i32_0 = arith.constant 0 : i32
    %c0_i32_1 = arith.constant 0 : i32
    return %c0_i32, %c0_i32_0 : i32, i32
  }
  func.func @transform_2(%arg0: i32) -> (i32, i32) {
    %c0_i32 = arith.constant 0 : i32
    %c0_i32_0 = arith.constant 0 : i32
    %c0_i32_1 = arith.constant 0 : i32
    return %c0_i32, %c0_i32_0 : i32, i32
  }
  func.func @transform_3(%arg0: i32) -> (i32, i32) {
    %c0_i32 = arith.constant 0 : i32
    %c0_i32_0 = arith.constant 0 : i32
    %c0_i32_1 = arith.constant 0 : i32
    return %c0_i32, %c0_i32_0 : i32, i32
  }
  func.func @transform_4(%arg0: i32) -> (i32, i32) {
    %c0_i32 = arith.constant 0 : i32
    %c0_i32_0 = arith.constant 0 : i32
    %c0_i32_1 = arith.constant 0 : i32
    return %c0_i32, %c0_i32_0 : i32, i32
  }
  func.func @transform_5(%arg0: i32) -> (i32, i32) {
    %c0_i32 = arith.constant 0 : i32
    %c0_i32_0 = arith.constant 0 : i32
    %c0_i32_1 = arith.constant 0 : i32
    return %c0_i32, %c0_i32_0 : i32, i32
  }
  func.func @transform_6(%arg0: i32) -> (i32, i32) {
    %c0_i32 = arith.constant 0 : i32
    %c0_i32_0 = arith.constant 0 : i32
    %c0_i32_1 = arith.constant 0 : i32
    return %c0_i32, %c0_i32_0 : i32, i32
  }
  func.func @transform_7(%arg0: i32) -> (i32, i32) {
    %c0_i32 = arith.constant 0 : i32
    %c0_i32_0 = arith.constant 0 : i32
    %c0_i32_1 = arith.constant 0 : i32
    return %c0_i32, %c0_i32_0 : i32, i32
  }
  func.func @transform_8(%arg0: i32) -> (i32, i32) {
    %c0_i32 = arith.constant 0 : i32
    %c0_i32_0 = arith.constant 0 : i32
    %c0_i32_1 = arith.constant 0 : i32
    return %c0_i32, %c0_i32_0 : i32, i32
  }
  func.func @transform_9(%arg0: i32) -> (i32, i32) {
    %c0_i32 = arith.constant 0 : i32
    %c0_i32_0 = arith.constant 0 : i32
    %c0_i32_1 = arith.constant 0 : i32
    return %c0_i32, %c0_i32_0 : i32, i32
  }
  func.func @transform_10(%arg0: i32) -> (i32, i32, i32) {
    %c0_i32 = arith.constant 0 : i32
    %c0_i32_0 = arith.constant 0 : i32
    %c0_i32_1 = arith.constant 0 : i32
    return %arg0, %c0_i32, %c0_i32_0 : i32, i32, i32
  }
}

</mosaic_0001>

<bundles_post_ra>
// kernel: tpu_custom_call.1
= control target key start
LH: loop header
LB: loop body
LE: loop exit
PB: predicated region body
PF: predicated region fallthrough
CT: control target
= control target key end

     0   :  { %15 = vsyncpa [#allocation6], 0  ;;  %s1900_s0 = inlined_call_operand.hbm [shape: f32[2,4,256], index: 0, kind: input, shape index: {}]   ;;  %s1901_s1 = inlined_call_operand.vmem [shape: f32[2,256], index: 1, kind: input, shape index: {}]   ;;  %s1902_s2 = inlined_call_operand.vmem [shape: f32[4,32], index: 2, kind: input, shape index: {}]   ;;  %s1903_s3 = inlined_call_operand.vmem [shape: f32[4,4], index: 3, kind: input, shape index: {}]   ;;  %s1904_s4 = inlined_call_operand.vmem [shape: f32[4,1], index: 4, kind: input, shape index: {}]   ;;  %s1905_s5 = inlined_call_operand.vmem [shape: f32[4,1], index: 5, kind: input, shape index: {}]   ;;  %s1906_s6 = inlined_call_operand.vmem [shape: f32[4,32], index: 6, kind: input, shape index: {}]   ;;  %s1907_s7 = inlined_call_operand.vmem [shape: f32[4,4], index: 7, kind: input, shape index: {}]   ;;  %s1908_s8 = inlined_call_operand.vmem [shape: f32[4,1], index: 8, kind: input, shape index: {}]   ;;  %s1909_s9 = inlined_call_operand.vmem [shape: f32[4,1], index: 9, kind: input, shape index: {}]   ;;  %s1910_s10 = inlined_call_operand.hbm [shape: f32[2,4,256], index: 10, kind: output, shape index: {}]  }
   0x1   :  { %17 = vsyncpa [#allocation6 + $0x1], 0 }
   0x2   :  { %18 = vsyncpa [#allocation7], 0 }
   0x3   :  { %20 = vsyncpa [#allocation7 + $0x1], 0  ;;  %s1559_s13 = smov 0   ;;  %s1561_s14 = smov 0  }
   0x4   :  { %s1563_s15 = smov 0   ;;  %s1565_s16 = smov 0  }
   0x5 LB: > { %1915 = sst [smem:[#allocation11_spill]] %s1487_s15  ;;  %s1580_s17 = sadd.s32 4294967295, %s1491_s16   ;;  %s1491_s16 = sphi %s1565_s16, %s1926_s16   ;;  %s1487_s15 = sphi %s1563_s15, %s1928_s15   ;;  %s1483_s14 = sphi %s1561_s14, %s1930_s14   ;;  %s1479_s13 = sphi %s1559_s13, %s1929_s13  }
   0x6   : > { %s1302_s18 = sadd.s32 4294967294, %s1491_s16   ;;  %s1584_s19 = sadd.s32 1, %s1491_s16  }
   0x7   : > { %1916 = sst [smem:[#allocation12_spill]] %s1584_s19  ;;  %s33_s20 = sadd.s32 1, %s1487_s15 }
   0x8   : > { %s30_s21 = ssub.s32 %s1491_s16, %s1584_s19  ;;  %p40_p0 = scmp.ne.s32.totalorder %s1487_s15, %s1483_s14 }
   0x9   : > { %p31_p1 = scmp.eq.s32.totalorder %s30_s21, 0  ;;  %p41_p2 = scmp.eq.s32.totalorder %s1491_s16, 0 }
   0xa   : > { %p46_p3 = scmp.ne.s32.totalorder %s1483_s14, %s1479_s13  ;;  %p47_p4 = scmp.eq.s32.totalorder %s1580_s17, 0 }
   0xb   : > { %s1596_s22 = scalar_select %p31_p1, %s1487_s15, %s33_s20  }
   0xc   : > { %p1598_p5 = por %p41_p2, %p40_p0  ;;  %p1602_p6 = por %p47_p4, %p46_p3 }
   0xd   : > { %1917 = sst [smem:[#allocation13_spill]] %s1596_s22  ;;  %p259_p7 = scmp.eq.s32.totalorder %s1580_s17, 1 }
   0xe   : > { %p265_p8 = scmp.eq.s32.totalorder %s1302_s18, 1  ;;  %p1344_p10 = scmp.lt.s32.totalorder %s1491_s16, 2 }
   0xf   : > { %p1609_p11 = por %p259_p7, %p40_p0  ;;  %s312_s27 = sand.u32 1, %s1487_s15  }
  0x10   : > { %p1613_p12 = por %p265_p8, %p46_p3  ;;  %s1330_s28 = sshll.u32 %s1491_s16, 3 }
  0x11   : > { %s1305_s29 = sshll.u32 %s312_s27, 3  ;;  %s321_s12 = scalar_lea.hbm %s1900_s0, %s1330_s28 }
  0x12   : > { %s1921_s26 = scalar_select %p1613_p12, 1, 0 }
  0x13   : > { %s323_s20 = sshll.u32 %s321_s12, 4  ;;  %s316_s18 = scalar_lea.vmem [#allocation5], %s1305_s29  ;;  %s324_s20 = int_to_ptr.hbm [resolvable:$true] %s323_s20 }
  0x14   : > { %1922 = sst [smem:[#allocation14_spill]] %s1921_s26  ;;  %s325_s21 = sshll.u32 %s316_s18, 4  ;;  %s326_s21 = int_to_ptr.vmem [resolvable:$true] %s325_s21 }
  0x15   : > { %p1624_p13 = pnand %p1344_p10, %p1598_p5  ;;  %p1308_p0 = scmp.ge.s32.totalorder %s1491_s16, 1 }
  0x16   : > { %p330_p1 = scmp.lt.s32.totalorder %s1491_s16, 3  ;;  %s313_s15 = scalar_lea.sflag [#allocation6], %s312_s27 }
  0x17   : > { %s1395_s19 = sshra.s32 %s324_s20, 4  ;;  %p1399_p3 = pneg %p1624_p13  ;;  %s1396_s19 = int_to_ptr.hbm [resolvable:$true] %s1395_s19 }
  0x18   : > { %s1397_s26 = scalar_lea.hbm %s1396_s19, 8  ;;  %s1402_s23 = scalar_lea.hbm %s1900_s0, 16 }
  0x19   : > { %p1398_p2 = scmp.ne.s32.totalorder %s1396_s19, %s1397_s26  ;;  %p1403_p5 = scmp.lt.s32.totalorder %s1396_s19, %s1900_s0 }
  0x1a   : > { %p1404_p8 = scmp.lt.s32.totalorder %s1402_s23, %s1397_s26 }
  0x1b   : > { %p1400_p4 = pnand %p1399_p3, %p1398_p2 }
  0x1c   : > { %p1405_p10 = por %p1404_p8, %p1403_p5 }
  0x1d   : > { %p1401_p7 = pneg %p1400_p4 }
  0x1f   : > { %p1406_p9 = pnand %p1405_p10, %p1401_p7 }
  0x21   : > { %1409 = shalt.err (!%p1406_p9)
}
  0x22   : > { %1339 = dma.hbm_to_vmem [thread:$0]  (!%p1624_p13), %s324_s20, 128, %s326_s21, %s313_s15  }
  0x23   : > { %p331_p2 = pnand %p1308_p0, %p330_p1 }
  0x24   : > { %s1645_s27 = sand.u32 (!%p331_p2), 1, %s1483_s14  }
  0x25   : > { %334 = sbr.rel (%p331_p2) target bundleno = 1380 (0x564), region = 60  ;;  %s1309_s19 = sshll.u32 (!%p331_p2), %s1645_s27, 3 }
  0x26   : > { %s337_s26 = scalar_lea.sflag (!%p331_p2), [#allocation6], %s1645_s27  ;;  %s1651_s12 = scalar_lea.vmem (!%p331_p2), [#allocation5], %s1309_s19 }
  0x2a   : > { %1470 = dma.done.wait (%p1602_p6), %s337_s26, 128  }
  0x2b   : > { %1472 = vsyncadd (%p1602_p6), %s337_s26, 4294967168  ;;  %v1493_v0 = vmov 0.0   ;;  %v382_v1 = vld [vmem:[%s1901_s1] ss:$2 sm:$0x3]  ;;  %vm391_vm0 = vcmask 1043456  }
  0x2c   : > { %378 = vst [vmem:[#allocation2] sm:$0xf] %v1493_v0  ;;  %v1311_v2 = vld [vmem:[%s1901_s1 + $0x1] ss:$2 sm:$0x3]  ;;  %v388_v3 = vperm.slane %v382_v1, 0 }
  0x2d   : > { %379 = vst [vmem:[#allocation2 + $0xc] sm:$0xf] %v1493_v0  ;;  %v389_v4 = vperm.slane %v382_v1, 1  ;;  %v451_v6 = vperm.slane %v1311_v2, 1  ;;  %s1494_s24 = smov 111   ;;  %s1495_s21 = smov 127  }
  0x2e   : > { %v450_v8 = vperm.slane %v1311_v2, 0  ;;  %s1496_s28 = smov 15   ;;  %s1497_s29 = smov 113   ;;  %v1672_v11 = vld [vmem:[%s1651_s12] sm:$0xff]  ;;  %vm396_vm1 = vcmask 908288   ;;  %vm457_vm2 = vcmask 924672  }
  0x2f   : > { %v390_v5 = vrot.slane %v389_v4, 4  ;;  %v452_v9 = vrot.slane %v451_v6, 4  ;;  %s1498_s23 = smov 1   ;;  %s1499_s30 = smov 17   ;;  %381 = vst [vmem:[#allocation2 + $0x4] sm:$0xff] %v1672_v11  ;;  %vm489_vm3 = vcmask 1039360  }
  0x30   : > { %vm510_vm4 = vcmask 7168   ;;  %vm477_vm5 = vcmask 121856   ;;  %vm416_vm6 = vcmask 138240   ;;  %s1500_s11 = smov 112   ;;  %s1501_s26 = smov 16   ;;  %vm647_vm7 = vcmask 31744  }
  0x31   : > { %v392_v7 = vsel %vm391_vm0, %v388_v3, %v390_v5  ;;  %v453_v10 = vsel %vm391_vm0, %v450_v8, %v452_v9  ;;  %vm594_vm8 = vcmask 916480   ;;  %vm440_vm9 = vcmask 130048   ;;  %s1331_s15 = sshll.u32 %s1580_s17, 3  ;;  %s1216_s17 = scalar_lea.sflag [#allocation7], %s1645_s27 }
  0x32   : > { %393 = vrot.lane.b32.xlu0 %v392_v7, %s1494_s24  ;;  %486 = vrot.lane.b32.xlu1 %v392_v7, %s1495_s21  ;;  %vm695_vm10 = vcmask 261120   ;;  %s1227_s18 = scalar_lea.hbm %s1910_s10, %s1331_s15 }
  0x33   : > { %549 = vrot.lane.b32.xlu2 %v392_v7, %s1496_s28 }
  0x34   : > { %v518_v43 = vld [vmem:[#allocation2 + $0xc] sm:$0xf] }
  0x35   : > { %v548_v52 = vld [vmem:[#allocation2 + $0xc] sm:$0xf] }
  0x36   : > { %v386_v13 = vld [vmem:[#allocation2 + $0x8] sm:$0xf]  ;;  %v385_v14 = vld [vmem:[#allocation2] sm:$0xff]  ;;  %v579_v60 = vld [vmem:[#allocation2 + $0xc] sm:$0xf] }
  0x37   : > { %v424_v21 = vld [vmem:[#allocation2 + $0x8] sm:$0xf]  ;;  %v602_v1 = vld [vmem:[#allocation2 + $0xc] sm:$0xf] }
  0x38   : > { %v448_v26 = vld [vmem:[#allocation2 + $0x8] sm:$0xf] }
  0x39   : > { %v485_v34 = vld [vmem:[#allocation2 + $0x8] sm:$0xf] }
  0x3a   : > { %454 = vrot.lane.b32.xlu0 %v453_v10, %s1497_s29  ;;  %519 = vrot.lane.b32.xlu1 %v453_v10, %s1498_s23 }
  0x3b   : > { %603 = vrot.lane.b32.xlu2 %v453_v10, %s1499_s30 }
  0x8d   : > { %v550_v45 = vpop.permute.xlu2 %549 }
  0x8e   : > { %v551_v48 = vrot.slane %v550_v45, 4 }
  0x90   : > { %v552_v53 = vsel %vm477_vm5, %v551_v48, %v550_v45  ;;  %v556_v54 = vmul.f32 %v551_v48, %v548_v52 }
  0x91   : > { %v555_v55 = vmul.f32 %v552_v53, %v1672_v11 }
  0x95   : > { %v604_v59 = vpop.permute.xlu2 %603 }
  0x96   : > { %v605_v61 = vrot.slane %v604_v59, 4 }
  0x98   : > { %v606_v2 = vsel %vm416_vm6, %v605_v61, %v604_v59  ;;  %v610_v3 = vmul.f32 %v605_v61, %v602_v1 }
  0x99   : > { %v609_v4 = vmul.f32 %v606_v2, %v1672_v11 }
  0xa4   : > { %v394_v12 = vpop.permute.xlu0 %393  ;;  %v487_v25 = vpop.permute.xlu1 %486 }
  0xa5   : > { %v395_v15 = vrot.slane %v394_v12, 4  ;;  %v488_v30 = vrot.slane %v487_v25, 4 }
  0xa7   : > { %v397_v16 = vsel %vm396_vm1, %v395_v15, %v394_v12  ;;  %v401_v17 = vmul.f32 %v395_v15, %v386_v13  ;;  %v490_v35 = vsel %vm489_vm3, %v488_v30, %v487_v25  ;;  %v494_v37 = vmul.f32 %v488_v30, %v485_v34 }
  0xa8   : > { %v400_v18 = vmul.f32 %v397_v16, %v385_v14  ;;  %v493_v38 = vmul.f32 %v490_v35, %v385_v14 }
  0xa9   : > { %406 = vst [vmem:[#allocation1 + $0x10] ss:$2 sm:$0xff] %v401_v17 }
  0xaa   : > { %404 = vst [vmem:[#allocation1] ss:$2 sm:$0xff] %v400_v18 }
  0xac   : > { %v455_v19 = vpop.permute.xlu0 %454  ;;  %v520_v36 = vpop.permute.xlu1 %519 }
  0xad   : > { %v456_v22 = vrot.slane %v455_v19, 4  ;;  %v521_v39 = vrot.slane %v520_v36, 4 }
  0xaf   : > { %v458_v27 = vsel %vm457_vm2, %v456_v22, %v455_v19  ;;  %v462_v28 = vmul.f32 %v456_v22, %v448_v26  ;;  %v522_v44 = vsel %vm510_vm4, %v521_v39, %v520_v36  ;;  %v526_v46 = vmul.f32 %v521_v39, %v518_v43  ;;  %v641_v39 = vld [vmem:[%s1903_s3] sm:$0xf] }
  0xb0   : > { %v409_v20 = vld.sshfl [vmem:[#allocation1 + $0x10] sm:$0xff pattern:$0x75316420]  ;;  %v461_v29 = vmul.f32 %v458_v27, %v385_v14  ;;  %v525_v47 = vmul.f32 %v522_v44, %v1672_v11 }
  0xb1   : > { %v407_v23 = vld.sshfl [vmem:[#allocation1] sm:$0xff pattern:$0x75316420]  ;;  %v408_v24 = vld.sshfl [vmem:[#allocation1 + $0x8] sm:$0xff pattern:$0x75316420]  ;;  %414 = vrot.lane.b32.xlu2 %v409_v20, %s1499_s30 }
  0xb2   : > { %428 = vst [vmem:[#allocation1 + $0x1] ss:$2 sm:$0xff] %v385_v14  ;;  %412 = vrot.lane.b32.xlu1 %v408_v24, %s1499_s30  ;;  %410 = vrot.lane.b32.xlu0 %v407_v23, %s1499_s30 }
  0xb3   : > { %430 = vst [vmem:[#allocation1 + $0x11] ss:$2 sm:$0xff] %v424_v21 }
  0xb9   : > { %v1680_v31 = vld.sshfl [vmem:[#allocation1] sm:$0xff pattern:$0x75316420]  ;;  %v1682_v32 = vld.sshfl [vmem:[#allocation1 + $0x8] sm:$0xff pattern:$0x75316420] }
  0xba   : > { %v1684_v33 = vld.sshfl [vmem:[#allocation1 + $0x10] sm:$0xff pattern:$0x75316420]  ;;  %465 = vst [vmem:[#allocation1] ss:$2 sm:$0xff] %v461_v29 }
  0xbb   : > { %467 = vst [vmem:[#allocation1 + $0x10] ss:$2 sm:$0xff] %v462_v28 }
  0xc1   : > { %v468_v40 = vld.sshfl [vmem:[#allocation1] sm:$0xff pattern:$0x75316420]  ;;  %v469_v41 = vld.sshfl [vmem:[#allocation1 + $0x8] sm:$0xff pattern:$0x75316420] }
  0xc2   : > { %v470_v42 = vld.sshfl [vmem:[#allocation1 + $0x10] sm:$0xff pattern:$0x75316420]  ;;  %498 = vst [vmem:[#allocation1 + $0x1] ss:$2 sm:$0xff] %v493_v38  ;;  %473 = vrot.lane.b32.xlu1 %v469_v41, %s1496_s28  ;;  %471 = vrot.lane.b32.xlu0 %v468_v40, %s1496_s28 }
  0xc3   : > { %500 = vst [vmem:[#allocation1 + $0x11] ss:$2 sm:$0xff] %v494_v37  ;;  %475 = vrot.lane.b32.xlu2 %v470_v42, %s1496_s28 }
  0xc9   : > { %v502_v49 = vld.sshfl [vmem:[#allocation1 + $0x8] sm:$0xff pattern:$0x75316420]  ;;  %v501_v50 = vld.sshfl [vmem:[#allocation1] sm:$0xff pattern:$0x75316420] }
  0xca   : > { %v503_v51 = vld.sshfl [vmem:[#allocation1 + $0x10] sm:$0xff pattern:$0x75316420]  ;;  %506 = vrot.lane.b32.xlu1 %v502_v49, %s1498_s23  ;;  %504 = vrot.lane.b32.xlu0 %v501_v50, %s1498_s23  ;;  %529 = vst [vmem:[#allocation1] ss:$2 sm:$0xff] %v525_v47 }
  0xcb   : > { %531 = vst [vmem:[#allocation1 + $0x10] ss:$2 sm:$0xff] %v526_v46  ;;  %508 = vrot.lane.b32.xlu2 %v503_v51, %s1498_s23 }
  0xd1   : > { %v533_v56 = vld.sshfl [vmem:[#allocation1 + $0x8] sm:$0xff pattern:$0x75316420]  ;;  %v532_v57 = vld.sshfl [vmem:[#allocation1] sm:$0xff pattern:$0x75316420] }
  0xd2   : > { %v534_v58 = vld.sshfl [vmem:[#allocation1 + $0x10] sm:$0xff pattern:$0x75316420]  ;;  %537 = vrot.lane.b32.xlu1 %v533_v56, %s1495_s21  ;;  %535 = vrot.lane.b32.xlu0 %v532_v57, %s1495_s21  ;;  %560 = vst [vmem:[#allocation1 + $0x1] ss:$2 sm:$0xff] %v555_v55 }
  0xd3   : > { %539 = vrot.lane.b32.xlu2 %v534_v58, %s1495_s21  ;;  %562 = vst [vmem:[#allocation1 + $0x11] ss:$2 sm:$0xff] %v556_v54 }
  0xd9   : > { %v564_v62 = vld.sshfl [vmem:[#allocation1 + $0x8] sm:$0xff pattern:$0x75316420]  ;;  %v563_v63 = vld.sshfl [vmem:[#allocation1] sm:$0xff pattern:$0x75316420] }
  0xda   : > { %v565_v0 = vld.sshfl [vmem:[#allocation1 + $0x10] sm:$0xff pattern:$0x75316420]  ;;  %568 = vrot.lane.b32.xlu1 %v564_v62, %s1497_s29  ;;  %566 = vrot.lane.b32.xlu0 %v563_v63, %s1497_s29  ;;  %582 = vst [vmem:[#allocation1] ss:$2 sm:$0xff] %v1672_v11 }
  0xdb   : > { %570 = vrot.lane.b32.xlu2 %v565_v0, %s1497_s29  ;;  %584 = vst [vmem:[#allocation1 + $0x10] ss:$2 sm:$0xff] %v579_v60  ;;  %v632_v60 = vld [vmem:[%s1902_s2] sm:$0xf] }
  0xe1   : > { %v586_v5 = vld.sshfl [vmem:[#allocation1 + $0x8] sm:$0xff pattern:$0x75316420]  ;;  %v585_v6 = vld.sshfl [vmem:[#allocation1] sm:$0xff pattern:$0x75316420] }
  0xe2   : > { %v587_v7 = vld.sshfl [vmem:[#allocation1 + $0x10] sm:$0xff pattern:$0x75316420]  ;;  %590 = vrot.lane.b32.xlu1 %v586_v5, %s1500_s11  ;;  %588 = vrot.lane.b32.xlu0 %v585_v6, %s1500_s11  ;;  %614 = vst [vmem:[#allocation1 + $0x1] ss:$2 sm:$0xff] %v609_v4 }
  0xe3   : > { %592 = vrot.lane.b32.xlu2 %v587_v7, %s1500_s11  ;;  %616 = vst [vmem:[#allocation1 + $0x11] ss:$2 sm:$0xff] %v610_v3 }
  0xe9   : > { %v618_v8 = vld.sshfl [vmem:[#allocation1 + $0x8] sm:$0xff pattern:$0x75316420]  ;;  %v617_v9 = vld.sshfl [vmem:[#allocation1] sm:$0xff pattern:$0x75316420] }
  0xea   : > { %v619_v10 = vld.sshfl [vmem:[#allocation1 + $0x10] sm:$0xff pattern:$0x75316420]  ;;  %622 = vrot.lane.b32.xlu1 %v618_v8, %s1494_s24  ;;  %620 = vrot.lane.b32.xlu0 %v617_v9, %s1494_s24  ;;  %644 = vst [vmem:[#allocation1] ss:$2 sm:$0xff] %v1672_v11 }
  0xeb   : > { %624 = vrot.lane.b32.xlu2 %v619_v10, %s1494_s24 }
  0xf1   : > { %v645_v12 = vld.sshfl [vmem:[#allocation1] sm:$0xff pattern:$0x75316420]  ;;  %v646_v13 = vld.sshfl [vmem:[#allocation1 + $0x8] sm:$0xff pattern:$0x75316420] }
  0xf2   : > { %436 = vrot.lane.b32.xlu1 %v1682_v32, %s1501_s26  ;;  %434 = vrot.lane.b32.xlu0 %v1680_v31, %s1501_s26 }
  0xf3   : > { %438 = vrot.lane.b32.xlu2 %v1684_v33, %s1501_s26  ;;  %1312 = vmatpush.msk.msra.mxu0 %vm391_vm0, %v645_v12 }
  0xf4   : > { %1314 = vmatpush.msk.msra.mxu1 %vm391_vm0, %v646_v13  ;;  %1313 = vmatmul.msk.f32.vlgmr.msra.gmra.mxu0 %vm647_vm7, %v641_v39 }
  0xf5   : > { %1315 = vmatmul.msk.f32.vlgmr.msra.gmra.mxu1 %vm647_vm7, %v641_v39  ;;  %v764_v39 = vld [vmem:[%s1904_s4] sm:$0xf] }
 0x10b   : > { %v415_v14 = vpop.permute.xlu2 %414 }
 0x11d   : > { %v476_v18 = vpop.permute.xlu2 %475 }
 0x124   : > { %v413_v11 = vpop.permute.xlu1 %412  ;;  %v411_v15 = vpop.permute.xlu0 %410 }
 0x125   : > { %v418_v16 = vsel %vm416_vm6, %v413_v11, %v415_v14  ;;  %v417_v17 = vsel %vm416_vm6, %v411_v15, %v413_v11  ;;  %v509_v19 = vpop.permute.xlu2 %508  ;;  %v1318_v15 = vld [vmem:[%s1901_s1 + $0x1] ss:$2 sm:$0x3] }
 0x126   : > { %422 = vst [vmem:[#allocation3] sm:$0xf] %v418_v16  ;;  %v805_v16 = vld [vmem:[%s1901_s1] ss:$2 sm:$0x3] }
 0x127   : > { %421 = vst [vmem:[#allocation3 + $0x30] sm:$0xf] %v417_v17  ;;  %v869_v17 = vperm.slane %v1318_v15, 1 }
 0x12d   : > { %v540_v24 = vpop.permute.xlu2 %539 }
 0x134   : > { %v474_v20 = vpop.permute.xlu1 %473  ;;  %v472_v21 = vpop.permute.xlu0 %471 }
 0x135   : > { %v479_v22 = vsel %vm477_vm5, %v474_v20, %v476_v18  ;;  %v478_v23 = vsel %vm477_vm5, %v472_v21, %v474_v20  ;;  %v571_v31 = vpop.permute.xlu2 %570  ;;  %v811_v18 = vperm.slane %v805_v16, 1  ;;  %v870_v20 = vrot.slane %v869_v17, 4 }
 0x136   : > { %483 = vst [vmem:[#allocation3 + $0x10] sm:$0xf] %v479_v22  ;;  %v810_v21 = vperm.slane %v805_v16, 0 }
 0x137   : > { %482 = vst [vmem:[#allocation3 + $0x18] sm:$0xf] %v478_v23  ;;  %v812_v22 = vrot.slane %v811_v18, 4 }
 0x13c   : > { %v507_v25 = vpop.permute.xlu1 %506  ;;  %v505_v26 = vpop.permute.xlu0 %504 }
 0x13d   : > { %v512_v27 = vsel %vm510_vm4, %v507_v25, %v509_v19  ;;  %v511_v28 = vsel %vm510_vm4, %v505_v26, %v507_v25  ;;  %v593_v38 = vpop.permute.xlu2 %592  ;;  %v868_v19 = vperm.slane %v1318_v15, 0  ;;  %v1502_v25 = vmov 0  }
 0x13e   : > { %516 = vst [vmem:[#allocation3 + $0x10] sm:$0xf0] %v512_v27  ;;  %1389 = vset.pattern.permute.xlu2 %v1502_v25  ;;  %1390 = vset.pattern.permute.xlu0 %v1502_v25 }
 0x13f   : > { %515 = vst [vmem:[#allocation3 + $0x18] sm:$0xf0] %v511_v28  ;;  %v871_v23 = vsel %vm391_vm0, %v868_v19, %v870_v20 }
 0x144   : > { %v538_v29 = vpop.permute.xlu1 %537  ;;  %v536_v30 = vpop.permute.xlu0 %535 }
 0x145   : > { %v542_v32 = vsel %vm489_vm3, %v538_v29, %v540_v24  ;;  %v541_v33 = vsel %vm489_vm3, %v536_v30, %v538_v29  ;;  %v625_v44 = vpop.permute.xlu2 %624  ;;  %v636_v58 = vld [vmem:[#allocation3 + $0x10] sm:$0xff]  ;;  %v813_v24 = vsel %vm391_vm0, %v810_v21, %v812_v22 }
 0x146   : > { %546 = vst [vmem:[#allocation3 + $0x20] sm:$0xf] %v542_v32  ;;  %v635_v59 = vld [vmem:[#allocation3 + $0x18] sm:$0xff] }
 0x147   : > { %545 = vst [vmem:[#allocation3 + $0x8] sm:$0xf] %v541_v33 }
 0x14c   : > { %v569_v34 = vpop.permute.xlu1 %568  ;;  %v567_v35 = vpop.permute.xlu0 %566 }
 0x14d   : > { %v573_v36 = vsel %vm457_vm2, %v569_v34, %v571_v31  ;;  %v572_v37 = vsel %vm457_vm2, %v567_v35, %v569_v34  ;;  %v439_v49 = vpop.permute.xlu2 %438 }
 0x14e   : > { %577 = vst [vmem:[#allocation3 + $0x20] sm:$0xf0] %v573_v36 }
 0x14f   : > { %576 = vst [vmem:[#allocation3 + $0x8] sm:$0xf0] %v572_v37 }
 0x154   : > { %v591_v40 = vpop.permute.xlu1 %590  ;;  %v589_v41 = vpop.permute.xlu0 %588 }
 0x155   : > { %v596_v42 = vsel %vm594_vm8, %v591_v40, %v593_v38  ;;  %v595_v43 = vsel %vm594_vm8, %v589_v41, %v591_v40  ;;  %v638_v56 = vld [vmem:[#allocation3 + $0x20] sm:$0xff] }
 0x156   : > { %600 = vst [vmem:[#allocation3 + $0x38] sm:$0xf] %v596_v42  ;;  %v637_v57 = vld [vmem:[#allocation3 + $0x8] sm:$0xff] }
 0x157   : > { %599 = vst [vmem:[#allocation3 + $0x28] sm:$0xf] %v595_v43 }
 0x15c   : > { %v623_v45 = vpop.permute.xlu1 %622  ;;  %v621_v46 = vpop.permute.xlu0 %620 }
 0x15d   : > { %v627_v47 = vsel %vm396_vm1, %v623_v45, %v625_v44  ;;  %v626_v48 = vsel %vm396_vm1, %v621_v46, %v623_v45  ;;  %v777_v44 = vld [vmem:[%s1905_s5] sm:$0xf]  ;;  %v1503_v46 = vmov 839922192  }
 0x15e   : > { %631 = vst [vmem:[#allocation3 + $0x38] sm:$0xf0] %v627_v47  ;;  %v786_v47 = vunpack.c.l.s4 %v1503_v46  ;;  %v1015_v46 = vld [vmem:[#allocation2 + $0xc] sm:$0xf] }
 0x15f   : > { %630 = vst [vmem:[#allocation3 + $0x28] sm:$0xf0] %v626_v48 }
 0x164   : > { %v437_v50 = vpop.permute.xlu1 %436  ;;  %v435_v51 = vpop.permute.xlu0 %434 }
 0x165   : > { %v442_v52 = vsel %vm440_vm9, %v437_v50, %v439_v49  ;;  %v441_v53 = vsel %vm440_vm9, %v435_v51, %v437_v50  ;;  %v640_v54 = vld [vmem:[#allocation3 + $0x38] sm:$0xff]  ;;  %v1772_v49 = vunpack.c.0.s8 %v786_v47 }
 0x166   : > { %446 = vst [vmem:[#allocation3] sm:$0xf0] %v442_v52  ;;  %v639_v55 = vld [vmem:[#allocation3 + $0x28] sm:$0xff]  ;;  %731 = vmatpush.msra.mxu3 %v640_v54 }
 0x167   : > { %445 = vst [vmem:[#allocation3 + $0x30] sm:$0xf0] %v441_v53  ;;  %711 = vmatpush.msra.mxu2 %v639_v55 }
 0x168   : > { %732 = vmatpush.msra.mxu3 %v638_v56 }
 0x169   : > { %712 = vmatpush.msra.mxu2 %v637_v57 }
 0x16a   : > { %733 = vmatpush.msra.mxu3 %v636_v58 }
 0x16b   : > { %713 = vmatpush.msra.mxu2 %v635_v59 }
 0x16d   : > { %v634_v61 = vld [vmem:[#allocation3] sm:$0xff] }
 0x16e   : > { %v633_v62 = vld [vmem:[#allocation3 + $0x30] sm:$0xff]  ;;  %734 = vmatpush.msra.mxu3 %v634_v61 }
 0x16f   : > { %714 = vmatpush.msra.mxu2 %v633_v62  ;;  %1317 = vmatmul.msk.f32.vlgmr.msra.gmra.mxu3 %vm695_vm10, %v632_v60 }
 0x170   : > { %1316 = vmatmul.msk.f32.vlgmr.msra.gmra.mxu2 %vm695_vm10, %v632_v60 }
 0x171   : > { %v672_v0 = vpop.f32.mrf.mxu0 }
 0x172   : > { %v692_v63 = vpop.f32.mrf.mxu1 }
 0x1f2   : > { %v736_v1 = vpop.f32.mrf.mxu3 }
 0x1f3   : > { %v716_v2 = vpop.f32.mrf.mxu2  ;;  %v737_v3 = vadd.f32 %v736_v1, %v692_v63 }
 0x1f4   : > { %v717_v4 = vadd.f32 %v716_v2, %v672_v0 }
 0x1f5   : > { %v741_v5 = vrot.slane %v737_v3, 4  ;;  %v746_v6 = vsel %vm391_vm0, %v737_v3, 0.0  ;;  %v752_v7 = vmul.f32 %v737_v3, %v737_v3 }
 0x1f6   : > { %v745_v8 = vsel %vm391_vm0, %v717_v4, 0.0  ;;  %v751_v9 = vmul.f32 %v717_v4, %v717_v4 }
 0x1f7   : > { %v747_v10 = vadd.f32 %v746_v6, %v745_v8  ;;  %v754_v12 = vsel %vm391_vm0, %v752_v7, 0.0  ;;  %v742_v13 = vsel %vm391_vm0, %v717_v4, %v741_v5 }
 0x1f8   : > { %v753_v14 = vsel %vm391_vm0, %v751_v9, 0.0 }
 0x1f9   : > { %748 = vadd.xlane.f32.xlu0 %v747_v10  ;;  %v755_v11 = vadd.f32 %v754_v12, %v753_v14 }
 0x1fb   : > { %756 = vadd.xlane.f32.xlu1 %v755_v11 }
 0x20d   : > { %963 = vrot.lane.b32.xlu0 %v813_v24, %s1496_s28 }
 0x214   : > { %1016 = vrot.lane.b32.xlu1 %v871_v23, %s1499_s30 }
 0x26c   : > { %v749_v26 = vpop.xlane.xlu0 %748 }
 0x26d   : > { %v759_v27 = vmul.f32 0.00390625, %v749_v26 }
 0x26e   : > { %v757_v28 = vpop.xlane.xlu1 %756 }
 0x26f   : > { %v761_v29 = vmul.f32 %v759_v27, %v759_v27  ;;  %v760_v30 = vmul.f32 0.00390625, %v757_v28 }
 0x271   : > { %v762_v31 = vsub.f32 %v760_v30, %v761_v29 }
 0x273   : > { %v763_v32 = vmax.f32 %v762_v31, 0.0 }
 0x275   : > { %v765_v33 = vadd.f32 1e-05, %v763_v32 }
 0x277   : > { %1391 = vrsqrt.f32 %v765_v33  ;;  %vm772_vm12 = vweird.f32 %v765_v33 }
 0x27d   : > { %v1392_v34 = vpop.eup %1391 }
 0x27e   : > { %v767_v35 = vmul.f32 %v1392_v34, %v765_v33  ;;  %vm773_vm11 = vweird.f32 %v1392_v34  ;;  %v962_v33 = vld [vmem:[#allocation2 + $0xc] sm:$0xf] }
 0x27f   : > { %vm774_vm13 = vmor %vm772_vm12, %vm773_vm11  ;;  %v964_v25 = vpop.permute.xlu0 %963 }
 0x280   : > { %v768_v36 = vmul.f32 %v1392_v34, %v767_v35  ;;  %v965_v28 = vrot.slane %v964_v25, 4 }
 0x282   : > { %v769_v37 = vmul.f32 0.5, %v768_v36  ;;  %v970_v35 = vmul.f32 %v965_v28, %v962_v33 }
 0x284   : > { %v770_v38 = vsub.f32 1.5, %v769_v37 }
 0x286   : > { %v771_v40 = vmul.f32 %v1392_v34, %v770_v38 }
 0x288   : > { %v775_v41 = vsel %vm774_vm13, %v1392_v34, %v771_v40  ;;  %v966_v34 = vsel %vm477_vm5, %v965_v28, %v964_v25  ;;  %v1017_v40 = vpop.permute.xlu1 %1016 }
 0x289   : > { %v776_v42 = vmul.f32 %v775_v41, %v764_v39  ;;  %v993_v41 = vld [vmem:[#allocation2 + $0xc] sm:$0xf] }
 0x28b   : > { %783 = vperm.xlu2 %1389, %v776_v42   ;;  %v778_v43 = vmul.f32 %v776_v42, %v759_v27  ;;  %v1018_v42 = vrot.slane %v1017_v40, 4 }
 0x28d   : > { %v779_v45 = vsub.f32 %v777_v44, %v778_v43  ;;  %v1019_v47 = vsel %vm416_vm6, %v1018_v42, %v1017_v40 }
 0x293   : > { %793 = vperm.xlu2 %1389, %v779_v45  }
 0x29b   : > { %814 = vrot.lane.b32.xlu2 %v813_v24, %s1494_s24 }
 0x2a3   : > { %872 = vrot.lane.b32.xlu2 %v871_v23, %s1497_s29 }
 0x2ab   : > { %902 = vrot.lane.b32.xlu2 %v813_v24, %s1495_s21  ;;  %v932_v24 = vld [vmem:[#allocation2 + $0xc] sm:$0xf] }
 0x2b3   : > { %933 = vrot.lane.b32.xlu2 %v871_v23, %s1498_s23 }
 0x2e5   : > { %v784_v48 = vpop.permute.xlu2 %783 }
 0x2e6   : > { %v788_v50 = vperm.slane %v784_v48, %v1772_v49  ;;  %v1023_v48 = vmul.f32 %v1018_v42, %v1015_v46  ;;  %v1045_v42 = vld [vmem:[%s1906_s6] sm:$0xf] }
 0x2e8   : > { %v790_v52 = vmul.f32 %v788_v50, %v742_v13 }
 0x2ed   : > { %v794_v51 = vpop.permute.xlu2 %793 }
 0x2ee   : > { %v798_v53 = vperm.slane %v794_v51, %v1772_v49 }
 0x2f0   : > { %v800_v54 = vadd.f32 %v798_v53, %v790_v52 }
 0x2f2   : > { %vm801_vm14 = vcmp.gt.f32.partialorder %v800_v54, 0.0  ;;  %v802_v55 = vmul.f32 0.2, %v800_v54 }
 0x2f4   : > { %v1776_v56 = vsel %vm801_vm14, %v800_v54, %v802_v55 }
 0x2f5   : > { %804 = vst [vmem:[#allocation2 + $0x4] sm:$0xff] %v1776_v56  ;;  %v815_v57 = vpop.permute.xlu2 %814  ;;  %v969_v36 = vmul.f32 %v966_v34, %v1776_v56  ;;  %v1022_v50 = vmul.f32 %v1019_v47, %v1776_v56 }
 0x2f6   : > { %v816_v58 = vrot.slane %v815_v57, 4 }
 0x2f8   : > { %v817_v61 = vsel %vm396_vm1, %v816_v58, %v815_v57 }
 0x2fc   : > { %v842_v59 = vld [vmem:[#allocation2] sm:$0xff]  ;;  %v808_v60 = vld [vmem:[#allocation2 + $0x8] sm:$0xf] }
 0x2fd   : > { %v820_v62 = vmul.f32 %v842_v59, %v817_v61  ;;  %v821_v63 = vmul.f32 %v816_v58, %v808_v60  ;;  %v873_v0 = vpop.permute.xlu2 %872  ;;  %v843_v5 = vld [vmem:[#allocation2 + $0x8] sm:$0xf] }
 0x2fe   : > { %v874_v1 = vrot.slane %v873_v0, 4  ;;  %v866_v8 = vld [vmem:[#allocation2 + $0x8] sm:$0xf] }
 0x2ff   : > { %824 = vst [vmem:[#allocation1] ss:$2 sm:$0xff] %v820_v62  ;;  %v901_v17 = vld [vmem:[#allocation2 + $0x8] sm:$0xf] }
 0x300   : > { %826 = vst [vmem:[#allocation1 + $0x10] ss:$2 sm:$0xff] %v821_v63  ;;  %v875_v7 = vsel %vm457_vm2, %v874_v1, %v873_v0  ;;  %v879_v12 = vmul.f32 %v874_v1, %v866_v8 }
 0x301   : > { %v878_v9 = vmul.f32 %v875_v7, %v842_v59 }
 0x305   : > { %v903_v6 = vpop.permute.xlu2 %902 }
 0x306   : > { %v828_v2 = vld.sshfl [vmem:[#allocation1 + $0x8] sm:$0xff pattern:$0x75316420]  ;;  %v827_v4 = vld.sshfl [vmem:[#allocation1] sm:$0xff pattern:$0x75316420] }
 0x307   : > { %v829_v3 = vld.sshfl [vmem:[#allocation1 + $0x10] sm:$0xff pattern:$0x75316420]  ;;  %832 = vrot.lane.b32.xlu1 %v828_v2, %s1499_s30  ;;  %830 = vrot.lane.b32.xlu2 %v827_v4, %s1499_s30  ;;  %847 = vst [vmem:[#allocation1 + $0x1] ss:$2 sm:$0xff] %v842_v59  ;;  %v904_v10 = vrot.slane %v903_v6, 4 }
 0x308   : > { %834 = vrot.lane.b32.xlu0 %v829_v3, %s1499_s30  ;;  %849 = vst [vmem:[#allocation1 + $0x11] ss:$2 sm:$0xff] %v843_v5 }
 0x309   : > { %v905_v15 = vsel %vm489_vm3, %v904_v10, %v903_v6  ;;  %v909_v20 = vmul.f32 %v904_v10, %v901_v17 }
 0x30a   : > { %v908_v18 = vmul.f32 %v905_v15, %v842_v59 }
 0x30d   : > { %v934_v16 = vpop.permute.xlu2 %933 }
 0x30e   : > { %v1784_v13 = vld.sshfl [vmem:[#allocation1] sm:$0xff pattern:$0x75316420]  ;;  %v1786_v14 = vld.sshfl [vmem:[#allocation1 + $0x8] sm:$0xff pattern:$0x75316420] }
 0x30f   : > { %882 = vst [vmem:[#allocation1] ss:$2 sm:$0xff] %v878_v9  ;;  %v1788_v11 = vld.sshfl [vmem:[#allocation1 + $0x10] sm:$0xff pattern:$0x75316420]  ;;  %v935_v19 = vrot.slane %v934_v16, 4 }
 0x310   : > { %884 = vst [vmem:[#allocation1 + $0x10] ss:$2 sm:$0xff] %v879_v12 }
 0x311   : > { %v936_v26 = vsel %vm510_vm4, %v935_v19, %v934_v16  ;;  %v940_v27 = vmul.f32 %v935_v19, %v932_v24 }
 0x312   : > { %v939_v29 = vmul.f32 %v936_v26, %v1776_v56 }
 0x316   : > { %v886_v21 = vld.sshfl [vmem:[#allocation1 + $0x8] sm:$0xff pattern:$0x75316420]  ;;  %v885_v22 = vld.sshfl [vmem:[#allocation1] sm:$0xff pattern:$0x75316420] }
 0x317   : > { %v887_v23 = vld.sshfl [vmem:[#allocation1 + $0x10] sm:$0xff pattern:$0x75316420]  ;;  %890 = vrot.lane.b32.xlu1 %v886_v21, %s1496_s28  ;;  %888 = vrot.lane.b32.xlu2 %v885_v22, %s1496_s28  ;;  %913 = vst [vmem:[#allocation1 + $0x1] ss:$2 sm:$0xff] %v908_v18 }
 0x318   : > { %892 = vrot.lane.b32.xlu0 %v887_v23, %s1496_s28  ;;  %915 = vst [vmem:[#allocation1 + $0x11] ss:$2 sm:$0xff] %v909_v20  ;;  %v1054_v23 = vld [vmem:[%s1907_s7] sm:$0xf]  ;;  %s1231_s28 = sshll.u32 %s1227_s18, 4  ;;  %s1232_s28 = int_to_ptr.hbm [resolvable:$true] %s1231_s28 }
 0x31e   : > { %v917_v30 = vld.sshfl [vmem:[#allocation1 + $0x8] sm:$0xff pattern:$0x75316420]  ;;  %v916_v31 = vld.sshfl [vmem:[#allocation1] sm:$0xff pattern:$0x75316420] }
 0x31f   : > { %v918_v32 = vld.sshfl [vmem:[#allocation1 + $0x10] sm:$0xff pattern:$0x75316420]  ;;  %921 = vrot.lane.b32.xlu1 %v917_v30, %s1498_s23  ;;  %919 = vrot.lane.b32.xlu2 %v916_v31, %s1498_s23  ;;  %943 = vst [vmem:[#allocation1] ss:$2 sm:$0xff] %v939_v29 }
 0x320   : > { %923 = vrot.lane.b32.xlu0 %v918_v32, %s1498_s23  ;;  %945 = vst [vmem:[#allocation1 + $0x10] ss:$2 sm:$0xff] %v940_v27 }
 0x326   : > { %v947_v37 = vld.sshfl [vmem:[#allocation1 + $0x8] sm:$0xff pattern:$0x75316420]  ;;  %v946_v38 = vld.sshfl [vmem:[#allocation1] sm:$0xff pattern:$0x75316420] }
 0x327   : > { %v948_v39 = vld.sshfl [vmem:[#allocation1 + $0x10] sm:$0xff pattern:$0x75316420]  ;;  %951 = vrot.lane.b32.xlu1 %v947_v37, %s1495_s21  ;;  %949 = vrot.lane.b32.xlu2 %v946_v38, %s1495_s21  ;;  %974 = vst [vmem:[#allocation1 + $0x1] ss:$2 sm:$0xff] %v969_v36 }
 0x328   : > { %953 = vrot.lane.b32.xlu0 %v948_v39, %s1495_s21  ;;  %976 = vst [vmem:[#allocation1 + $0x11] ss:$2 sm:$0xff] %v970_v35 }
 0x32e   : > { %v978_v43 = vld.sshfl [vmem:[#allocation1 + $0x8] sm:$0xff pattern:$0x75316420]  ;;  %v977_v44 = vld.sshfl [vmem:[#allocation1] sm:$0xff pattern:$0x75316420] }
 0x32f   : > { %v979_v45 = vld.sshfl [vmem:[#allocation1 + $0x10] sm:$0xff pattern:$0x75316420]  ;;  %982 = vrot.lane.b32.xlu1 %v978_v43, %s1497_s29  ;;  %980 = vrot.lane.b32.xlu2 %v977_v44, %s1497_s29  ;;  %996 = vst [vmem:[#allocation1] ss:$2 sm:$0xff] %v1776_v56 }
 0x330   : > { %984 = vrot.lane.b32.xlu0 %v979_v45, %s1497_s29  ;;  %998 = vst [vmem:[#allocation1 + $0x10] ss:$2 sm:$0xff] %v993_v41  ;;  %s1439_s29 = sshra.s32 %s1232_s28, 4  ;;  %s1440_s29 = int_to_ptr.hbm [resolvable:$true] %s1439_s29 }
 0x331   : > { %s1441_s23 = scalar_lea.hbm %s1440_s29, 8  ;;  %p1446_p0 = scmp.lt.s32.totalorder %s1440_s29, %s1910_s10 }
 0x332   : > { %p1442_p6 = scmp.ne.s32.totalorder %s1440_s29, %s1441_s23 }
 0x334   : > { %p1443_p9 = pnand %p1442_p6, %p1609_p11 }
 0x336   : > { %v999_v51 = vld.sshfl [vmem:[#allocation1] sm:$0xff pattern:$0x75316420]  ;;  %v1000_v52 = vld.sshfl [vmem:[#allocation1 + $0x8] sm:$0xff pattern:$0x75316420]  ;;  %p1444_p13 = pneg %p1443_p9 }
 0x337   : > { %v1001_v53 = vld.sshfl [vmem:[#allocation1 + $0x10] sm:$0xff pattern:$0x75316420]  ;;  %1002 = vrot.lane.b32.xlu2 %v999_v51, %s1500_s11  ;;  %1027 = vst [vmem:[#allocation1 + $0x1] ss:$2 sm:$0xff] %v1022_v50 }
 0x338   : > { %1006 = vrot.lane.b32.xlu0 %v1001_v53, %s1500_s11  ;;  %1029 = vst [vmem:[#allocation1 + $0x11] ss:$2 sm:$0xff] %v1023_v48 }
 0x33e   : > { %v1031_v54 = vld.sshfl [vmem:[#allocation1 + $0x8] sm:$0xff pattern:$0x75316420]  ;;  %v1030_v55 = vld.sshfl [vmem:[#allocation1] sm:$0xff pattern:$0x75316420] }
 0x33f   : > { %v1032_v57 = vld.sshfl [vmem:[#allocation1 + $0x10] sm:$0xff pattern:$0x75316420]  ;;  %1004 = vrot.lane.b32.xlu2 %v1000_v52, %s1500_s11  ;;  %1035 = vrot.lane.b32.xlu1 %v1031_v54, %s1494_s24  ;;  %1057 = vst [vmem:[#allocation1] ss:$2 sm:$0xff] %v1776_v56 }
 0x340   : > { %1037 = vrot.lane.b32.xlu0 %v1032_v57, %s1494_s24 }
 0x346   : > { %v1058_v58 = vld.sshfl [vmem:[#allocation1] sm:$0xff pattern:$0x75316420]  ;;  %v1059_v59 = vld.sshfl [vmem:[#allocation1 + $0x8] sm:$0xff pattern:$0x75316420] }
 0x347   : > { %855 = vrot.lane.b32.xlu1 %v1786_v14, %s1501_s26  ;;  %1033 = vrot.lane.b32.xlu2 %v1030_v55, %s1494_s24  ;;  %s377_s24 = scalar_lea.vmem [#allocation8], %s1309_s19 }
 0x348   : > { %857 = vrot.lane.b32.xlu0 %v1788_v11, %s1501_s26  ;;  %1319 = vmatpush.msk.msrb.mxu0 %vm391_vm0, %v1058_v58  ;;  %s1229_s21 = sshll.u32 %s377_s24, 4  ;;  %s1230_s21 = int_to_ptr.vmem [resolvable:$true] %s1229_s21 }
 0x349   : > { %1321 = vmatpush.msk.msrb.mxu1 %vm391_vm0, %v1059_v59  ;;  %1320 = vmatmul.msk.f32.vlgmr.msrb.gmra.mxu0 %vm647_vm7, %v1054_v23 }
 0x34a   : > { %1322 = vmatmul.msk.f32.vlgmr.msrb.gmra.mxu1 %vm647_vm7, %v1054_v23  ;;  %v1212_v23 = vld [vmem:[%s1651_s12] sm:$0xff]  ;;  %s1445_s12 = scalar_lea.hbm %s1910_s10, 16 }
 0x34b   : > { %p1447_p1 = scmp.lt.s32.totalorder %s1445_s12, %s1441_s23 }
 0x34d   : > { %p1448_p3 = por %p1447_p1, %p1446_p0 }
 0x34f   : > { %853 = vrot.lane.b32.xlu2 %v1784_v13, %s1501_s26  ;;  %p1449_p4 = pnand %p1448_p3, %p1444_p13 }
 0x361   : > { %v831_v56 = vpop.permute.xlu2 %830 }
 0x371   : > { %v889_v60 = vpop.permute.xlu2 %888 }
 0x379   : > { %v833_v61 = vpop.permute.xlu1 %832  ;;  %v920_v0 = vpop.permute.xlu2 %919 }
 0x37a   : > { %v835_v62 = vpop.permute.xlu0 %834  ;;  %v836_v63 = vsel %vm416_vm6, %v831_v56, %v833_v61 }
 0x37b   : > { %v837_v1 = vsel %vm416_vm6, %v833_v61, %v835_v62  ;;  %840 = vst [vmem:[#allocation3 + $0x30] sm:$0xf] %v836_v63 }
 0x37c   : > { %841 = vst [vmem:[#allocation3] sm:$0xf] %v837_v1 }
 0x381   : > { %v950_v2 = vpop.permute.xlu2 %949 }
 0x389   : > { %v891_v3 = vpop.permute.xlu1 %890  ;;  %v981_v4 = vpop.permute.xlu2 %980 }
 0x38a   : > { %v893_v5 = vpop.permute.xlu0 %892  ;;  %v894_v6 = vsel %vm477_vm5, %v889_v60, %v891_v3 }
 0x38b   : > { %v895_v7 = vsel %vm477_vm5, %v891_v3, %v893_v5  ;;  %898 = vst [vmem:[#allocation3 + $0x18] sm:$0xf] %v894_v6 }
 0x38c   : > { %899 = vst [vmem:[#allocation3 + $0x10] sm:$0xf] %v895_v7 }
 0x391   : > { %v922_v8 = vpop.permute.xlu1 %921  ;;  %v1003_v9 = vpop.permute.xlu2 %1002 }
 0x392   : > { %v924_v10 = vpop.permute.xlu0 %923  ;;  %v925_v12 = vsel %vm510_vm4, %v920_v0, %v922_v8 }
 0x393   : > { %v926_v13 = vsel %vm510_vm4, %v922_v8, %v924_v10  ;;  %929 = vst [vmem:[#allocation3 + $0x18] sm:$0xf0] %v925_v12  ;;  %v1175_v12 = vld [vmem:[%s1908_s8] sm:$0xf] }
 0x394   : > { %930 = vst [vmem:[#allocation3 + $0x10] sm:$0xf0] %v926_v13 }
 0x399   : > { %v952_v14 = vpop.permute.xlu1 %951  ;;  %v1005_v11 = vpop.permute.xlu2 %1004 }
 0x39a   : > { %v954_v15 = vpop.permute.xlu0 %953  ;;  %v955_v16 = vsel %vm489_vm3, %v950_v2, %v952_v14  ;;  %v1008_v17 = vsel %vm594_vm8, %v1003_v9, %v1005_v11  ;;  %v1048_v40 = vld [vmem:[#allocation3 + $0x18] sm:$0xff] }
 0x39b   : > { %v956_v18 = vsel %vm489_vm3, %v952_v14, %v954_v15  ;;  %959 = vst [vmem:[#allocation3 + $0x8] sm:$0xf] %v955_v16  ;;  %v1049_v41 = vld [vmem:[#allocation3 + $0x10] sm:$0xff]  ;;  %v1188_v16 = vld [vmem:[%s1909_s9] sm:$0xf] }
 0x39c   : > { %960 = vst [vmem:[#allocation3 + $0x20] sm:$0xf] %v956_v18 }
 0x39d   : > { %1012 = vst [vmem:[#allocation3 + $0x28] sm:$0xf] %v1008_v17 }
 0x3a1   : > { %v983_v19 = vpop.permute.xlu1 %982  ;;  %v1034_v26 = vpop.permute.xlu2 %1033 }
 0x3a2   : > { %v985_v20 = vpop.permute.xlu0 %984  ;;  %v986_v21 = vsel %vm457_vm2, %v981_v4, %v983_v19 }
 0x3a3   : > { %v987_v22 = vsel %vm457_vm2, %v983_v19, %v985_v20  ;;  %990 = vst [vmem:[#allocation3 + $0x8] sm:$0xf0] %v986_v21 }
 0x3a4   : > { %991 = vst [vmem:[#allocation3 + $0x20] sm:$0xf0] %v987_v22 }
 0x3a9   : > { %v854_v31 = vpop.permute.xlu2 %853 }
 0x3aa   : > { %v1007_v24 = vpop.permute.xlu0 %1006  ;;  %v1050_v38 = vld [vmem:[#allocation3 + $0x8] sm:$0xff] }
 0x3ab   : > { %v1009_v25 = vsel %vm594_vm8, %v1005_v11, %v1007_v24  ;;  %v1051_v39 = vld [vmem:[#allocation3 + $0x20] sm:$0xff] }
 0x3ac   : > { %1013 = vst [vmem:[#allocation3 + $0x38] sm:$0xf] %v1009_v25 }
 0x3b1   : > { %v1036_v27 = vpop.permute.xlu1 %1035 }
 0x3b2   : > { %v1038_v28 = vpop.permute.xlu0 %1037  ;;  %v1039_v29 = vsel %vm396_vm1, %v1034_v26, %v1036_v27 }
 0x3b3   : > { %v1040_v30 = vsel %vm396_vm1, %v1036_v27, %v1038_v28  ;;  %1043 = vst [vmem:[#allocation3 + $0x28] sm:$0xf0] %v1039_v29 }
 0x3b4   : > { %1044 = vst [vmem:[#allocation3 + $0x38] sm:$0xf0] %v1040_v30 }
 0x3b9   : > { %v856_v32 = vpop.permute.xlu1 %855 }
 0x3ba   : > { %v858_v33 = vpop.permute.xlu0 %857  ;;  %v859_v34 = vsel %vm440_vm9, %v854_v31, %v856_v32  ;;  %v1052_v35 = vld [vmem:[#allocation3 + $0x28] sm:$0xff] }
 0x3bb   : > { %v860_v36 = vsel %vm440_vm9, %v856_v32, %v858_v33  ;;  %863 = vst [vmem:[#allocation3 + $0x30] sm:$0xf0] %v859_v34  ;;  %1122 = vmatpush.msrb.mxu2 %v1052_v35  ;;  %v1053_v37 = vld [vmem:[#allocation3 + $0x38] sm:$0xff] }
 0x3bc   : > { %864 = vst [vmem:[#allocation3] sm:$0xf0] %v860_v36  ;;  %1142 = vmatpush.msrb.mxu3 %v1053_v37 }
 0x3bd   : > { %1123 = vmatpush.msrb.mxu2 %v1050_v38 }
 0x3be   : > { %1143 = vmatpush.msrb.mxu3 %v1051_v39 }
 0x3bf   : > { %1124 = vmatpush.msrb.mxu2 %v1048_v40 }
 0x3c0   : > { %1144 = vmatpush.msrb.mxu3 %v1049_v41 }
 0x3c2   : > { %v1046_v43 = vld [vmem:[#allocation3 + $0x30] sm:$0xff] }
 0x3c3   : > { %1125 = vmatpush.msrb.mxu2 %v1046_v43  ;;  %v1047_v44 = vld [vmem:[#allocation3] sm:$0xff] }
 0x3c4   : > { %1145 = vmatpush.msrb.mxu3 %v1047_v44  ;;  %1323 = vmatmul.msk.f32.vlgmr.msrb.gmra.mxu2 %vm695_vm10, %v1045_v42 }
 0x3c5   : > { %1324 = vmatmul.msk.f32.vlgmr.msrb.gmra.mxu3 %vm695_vm10, %v1045_v42 }
 0x3c6   : > { %v1084_v45 = vpop.f32.mrf.mxu0 }
 0x3c7   : > { %v1104_v46 = vpop.f32.mrf.mxu1 }
 0x447   : > { %v1127_v47 = vpop.f32.mrf.mxu2 }
 0x448   : > { %v1128_v48 = vadd.f32 %v1127_v47, %v1084_v45  ;;  %v1147_v50 = vpop.f32.mrf.mxu3 }
 0x449   : > { %v1148_v51 = vadd.f32 %v1147_v50, %v1104_v46 }
 0x44a   : > { %v1156_v52 = vsel %vm391_vm0, %v1128_v48, 0.0  ;;  %v1162_v53 = vmul.f32 %v1128_v48, %v1128_v48 }
 0x44b   : > { %v1152_v54 = vrot.slane %v1148_v51, 4  ;;  %v1157_v55 = vsel %vm391_vm0, %v1148_v51, 0.0  ;;  %v1163_v57 = vmul.f32 %v1148_v51, %v1148_v51 }
 0x44c   : > { %v1158_v58 = vadd.f32 %v1157_v55, %v1156_v52  ;;  %v1164_v59 = vsel %vm391_vm0, %v1162_v53, 0.0 }
 0x44d   : > { %v1165_v56 = vsel %vm391_vm0, %v1163_v57, 0.0  ;;  %v1153_v60 = vsel %vm391_vm0, %v1128_v48, %v1152_v54 }
 0x44e   : > { %1159 = vadd.xlane.f32.xlu2 %v1158_v58  ;;  %v1166_v61 = vadd.f32 %v1165_v56, %v1164_v59 }
 0x450   : > { %1167 = vadd.xlane.f32.xlu1 %v1166_v61 }
 0x4c1   : > { %v1160_v62 = vpop.xlane.xlu2 %1159 }
 0x4c2   : > { %v1170_v63 = vmul.f32 0.00390625, %v1160_v62 }
 0x4c3   : > { %v1168_v0 = vpop.xlane.xlu1 %1167 }
 0x4c4   : > { %v1172_v1 = vmul.f32 %v1170_v63, %v1170_v63  ;;  %v1171_v2 = vmul.f32 0.00390625, %v1168_v0 }
 0x4c6   : > { %v1173_v3 = vsub.f32 %v1171_v2, %v1172_v1 }
 0x4c8   : > { %v1174_v4 = vmax.f32 %v1173_v3, 0.0 }
 0x4ca   : > { %v1176_v5 = vadd.f32 1e-05, %v1174_v4 }
 0x4cc   : > { %1393 = vrsqrt.f32 %v1176_v5  ;;  %vm1183_vm0 = vweird.f32 %v1176_v5 }
 0x4d2   : > { %v1394_v6 = vpop.eup %1393 }
 0x4d3   : > { %v1178_v7 = vmul.f32 %v1394_v6, %v1176_v5  ;;  %vm1184_vm15 = vweird.f32 %v1394_v6 }
 0x4d4   : > { %vm1185_vm1 = vmor %vm1183_vm0, %vm1184_vm15 }
 0x4d5   : > { %v1179_v8 = vmul.f32 %v1394_v6, %v1178_v7 }
 0x4d7   : > { %v1180_v9 = vmul.f32 0.5, %v1179_v8 }
 0x4d9   : > { %v1181_v10 = vsub.f32 1.5, %v1180_v9 }
 0x4db   : > { %v1182_v13 = vmul.f32 %v1394_v6, %v1181_v10 }
 0x4dd   : > { %v1186_v14 = vsel %vm1185_vm1, %v1394_v6, %v1182_v13 }
 0x4de   : > { %v1187_v11 = vmul.f32 %v1186_v14, %v1175_v12 }
 0x4e0   : > { %1194 = vperm.xlu0 %1390, %v1187_v11   ;;  %v1189_v15 = vmul.f32 %v1187_v11, %v1170_v63 }
 0x4e2   : > { %v1190_v17 = vsub.f32 %v1188_v16, %v1189_v15 }
 0x4e8   : > { %1204 = vperm.xlu0 %1390, %v1190_v17  }
 0x552   : > { %v1195_v18 = vpop.permute.xlu0 %1194 }
 0x553   : > { %v1199_v19 = vperm.slane %v1195_v18, %v1772_v49 }
 0x555   : > { %v1201_v21 = vmul.f32 %v1199_v19, %v1153_v60 }
 0x55a   : > { %v1205_v20 = vpop.permute.xlu0 %1204 }
 0x55b   : > { %v1209_v22 = vperm.slane %v1205_v20, %v1772_v49 }
 0x55d   : > { %v1211_v24 = vadd.f32 %v1209_v22, %v1201_v21 }
 0x55f   : > { %v1213_v25 = vadd.f32 %v1212_v23, %v1211_v24 }
 0x561   : > { %1214 = vst [vmem:[%s377_s24] sm:$0xff] %v1213_v25 }
 0x562   : > { %1452 = shalt.err (!%p1449_p4)
}
 0x563   : > { %1334 = dma.vmem_to_hbm [thread:$0]  (%p1609_p11), %s1230_s21, 128, %s1232_s28, %s1216_s17  }
 0x564 PF: > { %s1243_s15 = sand.u32 1, %s1479_s13   ;;  %p1925_p7 = scmp.ge.s32.totalorder %s1491_s16, 2 }
 0x565   : > { %s1244_s22 = scalar_lea.sflag [#allocation7], %s1243_s15 }
 0x566   : > { %p1341_p5 = pnand %p1925_p7, %p1613_p12 }
 0x568   : > { %p1342_p8 = pneg %p1341_p5 }
 0x56a   : > { %1474 = dma.done.wait (%p1342_p8), %s1244_s22, 128  }
 0x56b   : > { %1476 = vsyncadd (%p1342_p8), %s1244_s22, 4294967168  ;;  %s1926_s16 = sld [smem:[#allocation12_spill]]  ;;  %s1929_s13 = smov %s1483_s14 }
 0x56c   : > { %s1927_s20 = sld [smem:[#allocation11_spill]] }
 0x56d   : > { %s1928_s15 = sld [smem:[#allocation13_spill]] }
 0x571   : > { %p23_p10 = scmp.ge.s32.totalorder %s1926_s16, 4  }
 0x572   : > { %s1930_s14 = smov %s1927_s20 }
 0x573   :  { %25 = sbr.rel (!%p23_p10) target bundleno = 5 (0x5), region = 130 }
 0x578   :  { %1250 = vsyncpa [#allocation6], 1 }
 0x579   :  { %1252 = vsyncpa [#allocation6 + $0x1], 1 }
 0x57a   :  { %1253 = vsyncpa [#allocation7], 1 }
 0x57b   :  { %1255 = vsyncpa [#allocation7 + $0x1], 1 }

</bundles_post_ra>
